<compile_context>
chip_gen: v7x
topology: tpu7x:2x2x1
jax: 0.10.0
libtpu: 0.0.40
codegen_flags: <defaults>
</compile_context>

<pallas_src>
import math

import jax
import jax.numpy as jnp
from jax.experimental import pallas as pl
from jax.experimental.pallas import tpu as pltpu


# ---------------------------------------------------------------------------
# Pallas kernels
# ---------------------------------------------------------------------------
def _conv_tanh_pool_kernel(p_ref, w_ref, b_ref, o_ref):
    """Fused conv (matmul on im2col patches) + 2x2 maxpool + bias + tanh.

    p_ref : (4, B*Hp*Wp, K) bf16  patches for the 4 positions of every 2x2
                                  pool window, B samples per grid step.
    w_ref : (K, Cout)       bf16  resident weights.
    b_ref : (1, Cout)       f32   resident bias.
    o_ref : (B*Hp*Wp, Cout) bf16  pooled activations for this batch block.
    """
    w = w_ref[...]
    # Max over the 4 pool positions of the raw conv results (f32 accumulate).
    r = jnp.dot(p_ref[0], w, preferred_element_type=jnp.float32)
    for t in range(1, 4):  # static unroll over the 4 pool positions
        r = jnp.maximum(
            r, jnp.dot(p_ref[t], w, preferred_element_type=jnp.float32))
    # Bias + tanh applied once, after the max (bit-exact vs. tanh-then-max).
    o_ref[...] = jnp.tanh(r + b_ref[...]).astype(o_ref.dtype)


def _classifier_kernel(z_ref, w1_ref, b1_ref, w2_ref, b2_ref, w3_ref, b3_ref,
                       o_ref):
    """Fused fc1+tanh -> fc2+tanh -> fc3. All operands resident in VMEM."""
    h = jnp.tanh(jnp.dot(z_ref[...], w1_ref[...],
                         preferred_element_type=jnp.float32) + b1_ref[...])
    h = jnp.tanh(jnp.dot(h.astype(jnp.bfloat16), w2_ref[...],
                         preferred_element_type=jnp.float32) + b2_ref[...])
    o_ref[...] = (jnp.dot(h.astype(jnp.bfloat16), w3_ref[...],
                          preferred_element_type=jnp.float32)
                  + b3_ref[...]).astype(o_ref.dtype)


# ---------------------------------------------------------------------------
# Wrappers
# ---------------------------------------------------------------------------
def conv_tanh_pool(x_nhwc, w_mat, b_row, k=5, block_batch=16):
    """x_nhwc: (N,H,W,C) bf16 -> pooled NHWC (N, Hp, Wp, Cout) bf16.

    Computes MaxPool2d(2)(tanh(Conv2d(x))) in a single Pallas kernel,
    processing `block_batch` samples per grid step.
    """
    N, H, W, C = x_nhwc.shape
    Ho, Wo = H - k + 1, W - k + 1
    Hp, Wp = Ho // 2, Wo // 2
    S = Hp * Wp
    K = k * k * C
    Cout = w_mat.shape[1]

    # im2col in NHWC: shifted slices concatenated on the channel (lane) axis.
    # Feature index ordering is (kh, kw, ci) — matched by prepare_params().
    cols = [x_nhwc[:, kh:kh + Ho, kw:kw + Wo, :]
            for kh in range(k) for kw in range(k)]
    p = jnp.concatenate(cols, axis=-1)                       # (N, Ho, Wo, K)
    # Group the 4 positions of each 2x2 pool window on a leading axis so the
    # kernel pools with elementwise max over four 2-D matmul results, and
    # flatten (N, Hp*Wp) so each grid step gets a plain 2-D matmul LHS.
    p = p.reshape(N, Hp, 2, Wp, 2, K).transpose(2, 4, 0, 1, 3, 5)
    p = p.reshape(4, N * S, K)

    # Batch block: whole batch for small N, else a multiple-of-16 block so
    # B*S keeps (sublane, lane)-friendly tiling for bf16 blocks.
    B = N if N <= block_batch else block_batch

    out = pl.pallas_call(
        _conv_tanh_pool_kernel,
        grid=(pl.cdiv(N, B),),
        out_shape=jax.ShapeDtypeStruct((N * S, Cout), jnp.bfloat16),
        in_specs=[
            pl.BlockSpec((4, B * S, K), lambda n: (0, n, 0)),
            pl.BlockSpec((K, Cout), lambda n: (0, 0)),       # resident weights
            pl.BlockSpec((1, Cout), lambda n: (0, 0)),       # resident bias
        ],
        out_specs=pl.BlockSpec((B * S, Cout), lambda n: (n, 0)),
        compiler_params=pltpu.CompilerParams(
            dimension_semantics=("parallel",)),
    )(p, w_mat, b_row)
    return out.reshape(N, Hp, Wp, Cout)


def classifier(z, w1, b1, w2, b2, w3, b3):
    """Fused three-layer MLP head: tanh(tanh(z@w1+b1)@w2+b2)@w3+b3."""
    N = z.shape[0]
    NC = w3.shape[1]
    return pl.pallas_call(
        _classifier_kernel,
        grid=(1,),
        out_shape=jax.ShapeDtypeStruct((N, NC), jnp.float32),
        in_specs=[
            pl.BlockSpec(z.shape, lambda i: (0, 0)),
            pl.BlockSpec(w1.shape, lambda i: (0, 0)),
            pl.BlockSpec(b1.shape, lambda i: (0, 0)),
            pl.BlockSpec(w2.shape, lambda i: (0, 0)),
            pl.BlockSpec(b2.shape, lambda i: (0, 0)),
            pl.BlockSpec(w3.shape, lambda i: (0, 0)),
            pl.BlockSpec(b3.shape, lambda i: (0, 0)),
        ],
        out_specs=pl.BlockSpec((N, NC), lambda i: (0, 0)),
        compiler_params=pltpu.CompilerParams(
            dimension_semantics=("arbitrary",)),
    )(z, w1, b1, w2, b2, w3, b3)


# ---------------------------------------------------------------------------
# LeNet-5 parameters (PyTorch convention) + one-time prep + forward
# ---------------------------------------------------------------------------
def init_params(key, num_classes):
    keys = jax.random.split(key, 10)

    def unif(k, shape, fan_in):
        bound = 1.0 / math.sqrt(fan_in)
        return jax.random.uniform(k, shape, jnp.float32, -bound, bound)

    return {
        "conv1_w": unif(keys[0], (6, 1, 5, 5), 1 * 5 * 5),
        "conv1_b": unif(keys[1], (6,), 1 * 5 * 5),
        "conv2_w": unif(keys[2], (16, 6, 5, 5), 6 * 5 * 5),
        "conv2_b": unif(keys[3], (16,), 6 * 5 * 5),
        "fc1_w": unif(keys[4], (120, 16 * 5 * 5), 16 * 5 * 5),
        "fc1_b": unif(keys[5], (120,), 16 * 5 * 5),
        "fc2_w": unif(keys[6], (84, 120), 120),
        "fc2_b": unif(keys[7], (84,), 120),
        "fc3_w": unif(keys[8], (num_classes, 84), 84),
        "fc3_b": unif(keys[9], (num_classes,), 84),   # FIXED: was (84,)
    }


def prepare_params(params):
    """One-time weight reshape/transpose/reorder/cast (off the hot path).

    Conv weights become (kh*kw*Cin, Cout) matching the im2col feature order.
    fc1 rows are permuted from PyTorch's NCHW flatten order (c,h,w) to this
    implementation's NHWC flatten order (h,w,c).  Matmul operands are bf16;
    biases stay f32 (accumulation / bias / tanh are done in f32).
    """
    bf = jnp.bfloat16
    fc1 = params["fc1_w"]                               # (120, 400), i = c*25+hw
    f1w = fc1.reshape(120, 16, 25).transpose(2, 1, 0).reshape(400, 120)
    return {
        "c1w": params["conv1_w"].transpose(2, 3, 1, 0).reshape(25 * 1, 6).astype(bf),
        "c1b": params["conv1_b"].reshape(1, 6),
        "c2w": params["conv2_w"].transpose(2, 3, 1, 0).reshape(25 * 6, 16).astype(bf),
        "c2b": params["conv2_b"].reshape(1, 16),
        "f1w": f1w.astype(bf),
        "f1b": params["fc1_b"].reshape(1, 120),
        "f2w": params["fc2_w"].T.astype(bf),            # (120, 84)
        "f2b": params["fc2_b"].reshape(1, 84),
        "f3w": params["fc3_w"].T.astype(bf),            # (84, num_classes)
        "f3b": params["fc3_b"].reshape(1, -1),          # (1, num_classes)
    }


def lenet5_forward(prepped, x_nchw):
    # layout: input is NCHW (N, 1, 32, 32) like the PyTorch module; Cin == 1
    # so the NCHW -> NHWC conversion is a pure (free) reshape.
    N = x_nchw.shape[0]
    x = x_nchw.reshape(N, 32, 32, 1).astype(jnp.bfloat16)

    # Conv2d(1,6,5) + Tanh + MaxPool(2)   -> (N, 14, 14, 6)
    y = conv_tanh_pool(x, prepped["c1w"], prepped["c1b"])
    # Conv2d(6,16,5) + Tanh + MaxPool(2)  -> (N, 5, 5, 16)
    y = conv_tanh_pool(y, prepped["c2w"], prepped["c2b"])

    # Flatten in (h, w, c) order; fc1 weight rows were permuted at prep time
    # to match PyTorch's (c, h, w) flatten order exactly.
    z = y.reshape(N, 5 * 5 * 16)
    return classifier(z, prepped["f1w"], prepped["f1b"],
                      prepped["f2w"], prepped["f2b"],
                      prepped["f3w"], prepped["f3b"])


if __name__ == "__main__":
    num_classes = 10
    key = jax.random.PRNGKey(0)
    k_params, k_x = jax.random.split(key)

    params = init_params(k_params, num_classes)
    prepped = prepare_params(params)

    # LeNet-5 requires 32x32 inputs so the flatten is 16*5*5 = 400.
    x = jax.random.normal(k_x, (2, 1, 32, 32), dtype=jnp.float32)

    logits = jax.jit(lenet5_forward)(prepped, x)
    jax.block_until_ready(logits)
    assert logits.shape == (2, num_classes)
    print("KERNEL_OK")
</pallas_src>

<mosaic_0001>
module attributes {stable_mosaic.version = 11 : i64} {
  func.func @_conv_tanh_pool_kernel(%arg0: i32, %arg1: memref<4x392x25xbf16, #tpu.memory_space<vmem>>, %arg2: memref<25x6xbf16, #tpu.memory_space<vmem>>, %arg3: memref<1x6xf32, #tpu.memory_space<vmem>>, %arg4: memref<392x6xbf16, #tpu.memory_space<vmem>>) attributes {dimension_semantics = [#tpu.dimension_semantics<parallel>], iteration_bounds = array<i64: 1>, scalar_prefetch = 0 : i64, scratch_operands = 0 : i64, tpu.core_type = #tpu.core_type<tc>, window_params = [{transform_indices = @transform_0, window_bounds = array<i64: 4, 392, 25>}, {pipeline_mode = #tpu.pipeline_mode<synchronous>, transform_indices = @transform_1, window_bounds = array<i64: 25, 6>}, {pipeline_mode = #tpu.pipeline_mode<synchronous>, transform_indices = @transform_2, window_bounds = array<i64: 1, 6>}, {transform_indices = @transform_3, window_bounds = array<i64: 392, 6>}]} {
    %c0 = arith.constant 0 : index
    %c0_0 = arith.constant 0 : index
    %0 = vector.load %arg2[%c0, %c0_0] : memref<25x6xbf16, #tpu.memory_space<vmem>>, vector<25x6xbf16>
    %c0_1 = arith.constant 0 : index
    %c0_2 = arith.constant 0 : index
    %c0_3 = arith.constant 0 : index
    %1 = vector.load %arg1[%c0_1, %c0_2, %c0_3] : memref<4x392x25xbf16, #tpu.memory_space<vmem>>, vector<1x392x25xbf16>
    %2 = vector.shape_cast %1 : vector<1x392x25xbf16> to vector<392x25xbf16>
    %cst = arith.constant dense<0.000000e+00> : vector<392x6xf32>
    %3 = tpu.matmul %2, %0, %cst {dimension_numbers = #tpu.dot_dimension_numbers<[1], [0], [0], [1], [0, 0, 1, 1], [], []>} : vector<392x25xbf16>, vector<25x6xbf16>, vector<392x6xf32> -> vector<392x6xf32>
    %c1 = arith.constant 1 : index
    %c0_4 = arith.constant 0 : index
    %c0_5 = arith.constant 0 : index
    %4 = vector.load %arg1[%c1, %c0_4, %c0_5] : memref<4x392x25xbf16, #tpu.memory_space<vmem>>, vector<1x392x25xbf16>
    %5 = vector.shape_cast %4 : vector<1x392x25xbf16> to vector<392x25xbf16>
    %cst_6 = arith.constant dense<0.000000e+00> : vector<392x6xf32>
    %6 = tpu.matmul %5, %0, %cst_6 {dimension_numbers = #tpu.dot_dimension_numbers<[1], [0], [0], [1], [0, 0, 1, 1], [], []>} : vector<392x25xbf16>, vector<25x6xbf16>, vector<392x6xf32> -> vector<392x6xf32>
    %7 = arith.maximumf %3, %6 : vector<392x6xf32>
    %c2 = arith.constant 2 : index
    %c0_7 = arith.constant 0 : index
    %c0_8 = arith.constant 0 : index
    %8 = vector.load %arg1[%c2, %c0_7, %c0_8] : memref<4x392x25xbf16, #tpu.memory_space<vmem>>, vector<1x392x25xbf16>
    %9 = vector.shape_cast %8 : vector<1x392x25xbf16> to vector<392x25xbf16>
    %cst_9 = arith.constant dense<0.000000e+00> : vector<392x6xf32>
    %10 = tpu.matmul %9, %0, %cst_9 {dimension_numbers = #tpu.dot_dimension_numbers<[1], [0], [0], [1], [0, 0, 1, 1], [], []>} : vector<392x25xbf16>, vector<25x6xbf16>, vector<392x6xf32> -> vector<392x6xf32>
    %11 = arith.maximumf %7, %10 : vector<392x6xf32>
    %c3 = arith.constant 3 : index
    %c0_10 = arith.constant 0 : index
    %c0_11 = arith.constant 0 : index
    %12 = vector.load %arg1[%c3, %c0_10, %c0_11] : memref<4x392x25xbf16, #tpu.memory_space<vmem>>, vector<1x392x25xbf16>
    %13 = vector.shape_cast %12 : vector<1x392x25xbf16> to vector<392x25xbf16>
    %cst_12 = arith.constant dense<0.000000e+00> : vector<392x6xf32>
    %14 = tpu.matmul %13, %0, %cst_12 {dimension_numbers = #tpu.dot_dimension_numbers<[1], [0], [0], [1], [0, 0, 1, 1], [], []>} : vector<392x25xbf16>, vector<25x6xbf16>, vector<392x6xf32> -> vector<392x6xf32>
    %15 = arith.maximumf %11, %14 : vector<392x6xf32>
    %c0_13 = arith.constant 0 : index
    %c0_14 = arith.constant 0 : index
    %16 = vector.load %arg3[%c0_13, %c0_14] : memref<1x6xf32, #tpu.memory_space<vmem>>, vector<1x6xf32>
    %17 = vector.broadcast %16 : vector<1x6xf32> to vector<392x6xf32>
    %18 = arith.addf %15, %17 : vector<392x6xf32>
    %19 = math.tanh %18 : vector<392x6xf32>
    %20 = arith.truncf %19 : vector<392x6xf32> to vector<392x6xbf16>
    %c0_15 = arith.constant 0 : index
    %c0_16 = arith.constant 0 : index
    %21 = vector.load %arg4[%c0_15, %c0_16] : memref<392x6xbf16, #tpu.memory_space<vmem>>, vector<392x6xbf16>
    tpu.vector_store %arg4[%c0_15, %c0_16], %20 {strides = array<i32>} : memref<392x6xbf16, #tpu.memory_space<vmem>>, vector<392x6xbf16>,
    return
  }
  func.func @transform_0(%arg0: i32) -> (i32, i32, i32) {
    %c0_i32 = arith.constant 0 : i32
    %c0_i32_0 = arith.constant 0 : i32
    %c0_i32_1 = arith.constant 0 : i32
    return %c0_i32, %arg0, %c0_i32_0 : i32, i32, i32
  }
  func.func @transform_1(%arg0: i32) -> (i32, i32) {
    %c0_i32 = arith.constant 0 : i32
    %c0_i32_0 = arith.constant 0 : i32
    %c0_i32_1 = arith.constant 0 : i32
    return %c0_i32, %c0_i32_0 : i32, i32
  }
  func.func @transform_2(%arg0: i32) -> (i32, i32) {
    %c0_i32 = arith.constant 0 : i32
    %c0_i32_0 = arith.constant 0 : i32
    %c0_i32_1 = arith.constant 0 : i32
    return %c0_i32, %c0_i32_0 : i32, i32
  }
  func.func @transform_3(%arg0: i32) -> (i32, i32) {
    %c0_i32 = arith.constant 0 : i32
    %c0_i32_0 = arith.constant 0 : i32
    return %arg0, %c0_i32 : i32, i32
  }
}

module attributes {stable_mosaic.version = 11 : i64} {
  func.func @_conv_tanh_pool_kernel(%arg0: i32, %arg1: memref<4x50x150xbf16, #tpu.memory_space<vmem>>, %arg2: memref<150x16xbf16, #tpu.memory_space<vmem>>, %arg3: memref<1x16xf32, #tpu.memory_space<vmem>>, %arg4: memref<50x16xbf16, #tpu.memory_space<vmem>>) attributes {dimension_semantics = [#tpu.dimension_semantics<parallel>], iteration_bounds = array<i64: 1>, scalar_prefetch = 0 : i64, scratch_operands = 0 : i64, tpu.core_type = #tpu.core_type<tc>, window_params = [{transform_indices = @transform_0, window_bounds = array<i64: 4, 50, 150>}, {pipeline_mode = #tpu.pipeline_mode<synchronous>, transform_indices = @transform_1, window_bounds = array<i64: 150, 16>}, {pipeline_mode = #tpu.pipeline_mode<synchronous>, transform_indices = @transform_2, window_bounds = array<i64: 1, 16>}, {transform_indices = @transform_3, window_bounds = array<i64: 50, 16>}]} {
    %c0 = arith.constant 0 : index
    %c0_0 = arith.constant 0 : index
    %0 = vector.load %arg2[%c0, %c0_0] : memref<150x16xbf16, #tpu.memory_space<vmem>>, vector<150x16xbf16>
    %c0_1 = arith.constant 0 : index
    %c0_2 = arith.constant 0 : index
    %c0_3 = arith.constant 0 : index
    %1 = vector.load %arg1[%c0_1, %c0_2, %c0_3] : memref<4x50x150xbf16, #tpu.memory_space<vmem>>, vector<1x50x150xbf16>
    %2 = vector.shape_cast %1 : vector<1x50x150xbf16> to vector<50x150xbf16>
    %cst = arith.constant dense<0.000000e+00> : vector<50x16xf32>
    %3 = tpu.matmul %2, %0, %cst {dimension_numbers = #tpu.dot_dimension_numbers<[1], [0], [0], [1], [0, 0, 1, 1], [], []>} : vector<50x150xbf16>, vector<150x16xbf16>, vector<50x16xf32> -> vector<50x16xf32>
    %c1 = arith.constant 1 : index
    %c0_4 = arith.constant 0 : index
    %c0_5 = arith.constant 0 : index
    %4 = vector.load %arg1[%c1, %c0_4, %c0_5] : memref<4x50x150xbf16, #tpu.memory_space<vmem>>, vector<1x50x150xbf16>
    %5 = vector.shape_cast %4 : vector<1x50x150xbf16> to vector<50x150xbf16>
    %cst_6 = arith.constant dense<0.000000e+00> : vector<50x16xf32>
    %6 = tpu.matmul %5, %0, %cst_6 {dimension_numbers = #tpu.dot_dimension_numbers<[1], [0], [0], [1], [0, 0, 1, 1], [], []>} : vector<50x150xbf16>, vector<150x16xbf16>, vector<50x16xf32> -> vector<50x16xf32>
    %7 = arith.maximumf %3, %6 : vector<50x16xf32>
    %c2 = arith.constant 2 : index
    %c0_7 = arith.constant 0 : index
    %c0_8 = arith.constant 0 : index
    %8 = vector.load %arg1[%c2, %c0_7, %c0_8] : memref<4x50x150xbf16, #tpu.memory_space<vmem>>, vector<1x50x150xbf16>
    %9 = vector.shape_cast %8 : vector<1x50x150xbf16> to vector<50x150xbf16>
    %cst_9 = arith.constant dense<0.000000e+00> : vector<50x16xf32>
    %10 = tpu.matmul %9, %0, %cst_9 {dimension_numbers = #tpu.dot_dimension_numbers<[1], [0], [0], [1], [0, 0, 1, 1], [], []>} : vector<50x150xbf16>, vector<150x16xbf16>, vector<50x16xf32> -> vector<50x16xf32>
    %11 = arith.maximumf %7, %10 : vector<50x16xf32>
    %c3 = arith.constant 3 : index
    %c0_10 = arith.constant 0 : index
    %c0_11 = arith.constant 0 : index
    %12 = vector.load %arg1[%c3, %c0_10, %c0_11] : memref<4x50x150xbf16, #tpu.memory_space<vmem>>, vector<1x50x150xbf16>
    %13 = vector.shape_cast %12 : vector<1x50x150xbf16> to vector<50x150xbf16>
    %cst_12 = arith.constant dense<0.000000e+00> : vector<50x16xf32>
    %14 = tpu.matmul %13, %0, %cst_12 {dimension_numbers = #tpu.dot_dimension_numbers<[1], [0], [0], [1], [0, 0, 1, 1], [], []>} : vector<50x150xbf16>, vector<150x16xbf16>, vector<50x16xf32> -> vector<50x16xf32>
    %15 = arith.maximumf %11, %14 : vector<50x16xf32>
    %c0_13 = arith.constant 0 : index
    %c0_14 = arith.constant 0 : index
    %16 = vector.load %arg3[%c0_13, %c0_14] : memref<1x16xf32, #tpu.memory_space<vmem>>, vector<1x16xf32>
    %17 = vector.broadcast %16 : vector<1x16xf32> to vector<50x16xf32>
    %18 = arith.addf %15, %17 : vector<50x16xf32>
    %19 = math.tanh %18 : vector<50x16xf32>
    %20 = arith.truncf %19 : vector<50x16xf32> to vector<50x16xbf16>
    %c0_15 = arith.constant 0 : index
    %c0_16 = arith.constant 0 : index
    %21 = vector.load %arg4[%c0_15, %c0_16] : memref<50x16xbf16, #tpu.memory_space<vmem>>, vector<50x16xbf16>
    tpu.vector_store %arg4[%c0_15, %c0_16], %20 {strides = array<i32>} : memref<50x16xbf16, #tpu.memory_space<vmem>>, vector<50x16xbf16>,
    return
  }
  func.func @transform_0(%arg0: i32) -> (i32, i32, i32) {
    %c0_i32 = arith.constant 0 : i32
    %c0_i32_0 = arith.constant 0 : i32
    %c0_i32_1 = arith.constant 0 : i32
    return %c0_i32, %arg0, %c0_i32_0 : i32, i32, i32
  }
  func.func @transform_1(%arg0: i32) -> (i32, i32) {
    %c0_i32 = arith.constant 0 : i32
    %c0_i32_0 = arith.constant 0 : i32
    %c0_i32_1 = arith.constant 0 : i32
    return %c0_i32, %c0_i32_0 : i32, i32
  }
  func.func @transform_2(%arg0: i32) -> (i32, i32) {
    %c0_i32 = arith.constant 0 : i32
    %c0_i32_0 = arith.constant 0 : i32
    %c0_i32_1 = arith.constant 0 : i32
    return %c0_i32, %c0_i32_0 : i32, i32
  }
  func.func @transform_3(%arg0: i32) -> (i32, i32) {
    %c0_i32 = arith.constant 0 : i32
    %c0_i32_0 = arith.constant 0 : i32
    return %arg0, %c0_i32 : i32, i32
  }
}

module attributes {stable_mosaic.version = 11 : i64} {
  func.func @_classifier_kernel(%arg0: i32, %arg1: memref<2x400xbf16, #tpu.memory_space<vmem>>, %arg2: memref<400x120xbf16, #tpu.memory_space<vmem>>, %arg3: memref<1x120xf32, #tpu.memory_space<vmem>>, %arg4: memref<120x84xbf16, #tpu.memory_space<vmem>>, %arg5: memref<1x84xf32, #tpu.memory_space<vmem>>, %arg6: memref<84x10xbf16, #tpu.memory_space<vmem>>, %arg7: memref<1x10xf32, #tpu.memory_space<vmem>>, %arg8: memref<2x10xf32, #tpu.memory_space<vmem>>) attributes {dimension_semantics = [#tpu.dimension_semantics<arbitrary>], iteration_bounds = array<i64: 1>, scalar_prefetch = 0 : i64, scratch_operands = 0 : i64, tpu.core_type = #tpu.core_type<tc>, window_params = [{pipeline_mode = #tpu.pipeline_mode<synchronous>, transform_indices = @transform_0, window_bounds = array<i64: 2, 400>}, {pipeline_mode = #tpu.pipeline_mode<synchronous>, transform_indices = @transform_1, window_bounds = array<i64: 400, 120>}, {pipeline_mode = #tpu.pipeline_mode<synchronous>, transform_indices = @transform_2, window_bounds = array<i64: 1, 120>}, {pipeline_mode = #tpu.pipeline_mode<synchronous>, transform_indices = @transform_3, window_bounds = array<i64: 120, 84>}, {pipeline_mode = #tpu.pipeline_mode<synchronous>, transform_indices = @transform_4, window_bounds = array<i64: 1, 84>}, {pipeline_mode = #tpu.pipeline_mode<synchronous>, transform_indices = @transform_5, window_bounds = array<i64: 84, 10>}, {pipeline_mode = #tpu.pipeline_mode<synchronous>, transform_indices = @transform_6, window_bounds = array<i64: 1, 10>}, {pipeline_mode = #tpu.pipeline_mode<synchronous>, transform_indices = @transform_7, window_bounds = array<i64: 2, 10>}]} {
    %c0 = arith.constant 0 : index
    %c0_0 = arith.constant 0 : index
    %0 = vector.load %arg1[%c0, %c0_0] : memref<2x400xbf16, #tpu.memory_space<vmem>>, vector<2x400xbf16>
    %c0_1 = arith.constant 0 : index
    %c0_2 = arith.constant 0 : index
    %1 = vector.load %arg2[%c0_1, %c0_2] : memref<400x120xbf16, #tpu.memory_space<vmem>>, vector<400x120xbf16>
    %cst = arith.constant dense<0.000000e+00> : vector<2x120xf32>
    %2 = tpu.matmul %0, %1, %cst {dimension_numbers = #tpu.dot_dimension_numbers<[1], [0], [0], [1], [0, 0, 1, 1], [], []>} : vector<2x400xbf16>, vector<400x120xbf16>, vector<2x120xf32> -> vector<2x120xf32>
    %c0_3 = arith.constant 0 : index
    %c0_4 = arith.constant 0 : index
    %3 = vector.load %arg3[%c0_3, %c0_4] : memref<1x120xf32, #tpu.memory_space<vmem>>, vector<1x120xf32>
    %4 = vector.broadcast %3 : vector<1x120xf32> to vector<2x120xf32>
    %5 = arith.addf %2, %4 : vector<2x120xf32>
    %6 = math.tanh %5 : vector<2x120xf32>
    %7 = arith.truncf %6 : vector<2x120xf32> to vector<2x120xbf16>
    %c0_5 = arith.constant 0 : index
    %c0_6 = arith.constant 0 : index
    %8 = vector.load %arg4[%c0_5, %c0_6] : memref<120x84xbf16, #tpu.memory_space<vmem>>, vector<120x84xbf16>
    %cst_7 = arith.constant dense<0.000000e+00> : vector<2x84xf32>
    %9 = tpu.matmul %7, %8, %cst_7 {dimension_numbers = #tpu.dot_dimension_numbers<[1], [0], [0], [1], [0, 0, 1, 1], [], []>} : vector<2x120xbf16>, vector<120x84xbf16>, vector<2x84xf32> -> vector<2x84xf32>
    %c0_8 = arith.constant 0 : index
    %c0_9 = arith.constant 0 : index
    %10 = vector.load %arg5[%c0_8, %c0_9] : memref<1x84xf32, #tpu.memory_space<vmem>>, vector<1x84xf32>
    %11 = vector.broadcast %10 : vector<1x84xf32> to vector<2x84xf32>
    %12 = arith.addf %9, %11 : vector<2x84xf32>
    %13 = math.tanh %12 : vector<2x84xf32>
    %14 = arith.truncf %13 : vector<2x84xf32> to vector<2x84xbf16>
    %c0_10 = arith.constant 0 : index
    %c0_11 = arith.constant 0 : index
    %15 = vector.load %arg6[%c0_10, %c0_11] : memref<84x10xbf16, #tpu.memory_space<vmem>>, vector<84x10xbf16>
    %cst_12 = arith.constant dense<0.000000e+00> : vector<2x10xf32>
    %16 = tpu.matmul %14, %15, %cst_12 {dimension_numbers = #tpu.dot_dimension_numbers<[1], [0], [0], [1], [0, 0, 1, 1], [], []>} : vector<2x84xbf16>, vector<84x10xbf16>, vector<2x10xf32> -> vector<2x10xf32>
    %c0_13 = arith.constant 0 : index
    %c0_14 = arith.constant 0 : index
    %17 = vector.load %arg7[%c0_13, %c0_14] : memref<1x10xf32, #tpu.memory_space<vmem>>, vector<1x10xf32>
    %18 = vector.broadcast %17 : vector<1x10xf32> to vector<2x10xf32>
    %19 = arith.addf %16, %18 : vector<2x10xf32>
    %c0_15 = arith.constant 0 : index
    %c0_16 = arith.constant 0 : index
    %20 = vector.load %arg8[%c0_15, %c0_16] : memref<2x10xf32, #tpu.memory_space<vmem>>, vector<2x10xf32>
    tpu.vector_store %arg8[%c0_15, %c0_16], %19 {strides = array<i32>} : memref<2x10xf32, #tpu.memory_space<vmem>>, vector<2x10xf32>,
    return
  }
  func.func @transform_0(%arg0: i32) -> (i32, i32) {
    %c0_i32 = arith.constant 0 : i32
    %c0_i32_0 = arith.constant 0 : i32
    %c0_i32_1 = arith.constant 0 : i32
    return %c0_i32, %c0_i32_0 : i32, i32
  }
  func.func @transform_1(%arg0: i32) -> (i32, i32) {
    %c0_i32 = arith.constant 0 : i32
    %c0_i32_0 = arith.constant 0 : i32
    %c0_i32_1 = arith.constant 0 : i32
    return %c0_i32, %c0_i32_0 : i32, i32
  }
  func.func @transform_2(%arg0: i32) -> (i32, i32) {
    %c0_i32 = arith.constant 0 : i32
    %c0_i32_0 = arith.constant 0 : i32
    %c0_i32_1 = arith.constant 0 : i32
    return %c0_i32, %c0_i32_0 : i32, i32
  }
  func.func @transform_3(%arg0: i32) -> (i32, i32) {
    %c0_i32 = arith.constant 0 : i32
    %c0_i32_0 = arith.constant 0 : i32
    %c0_i32_1 = arith.constant 0 : i32
    return %c0_i32, %c0_i32_0 : i32, i32
  }
  func.func @transform_4(%arg0: i32) -> (i32, i32) {
    %c0_i32 = arith.constant 0 : i32
    %c0_i32_0 = arith.constant 0 : i32
    %c0_i32_1 = arith.constant 0 : i32
    return %c0_i32, %c0_i32_0 : i32, i32
  }
  func.func @transform_5(%arg0: i32) -> (i32, i32) {
    %c0_i32 = arith.constant 0 : i32
    %c0_i32_0 = arith.constant 0 : i32
    %c0_i32_1 = arith.constant 0 : i32
    return %c0_i32, %c0_i32_0 : i32, i32
  }
  func.func @transform_6(%arg0: i32) -> (i32, i32) {
    %c0_i32 = arith.constant 0 : i32
    %c0_i32_0 = arith.constant 0 : i32
    %c0_i32_1 = arith.constant 0 : i32
    return %c0_i32, %c0_i32_0 : i32, i32
  }
  func.func @transform_7(%arg0: i32) -> (i32, i32) {
    %c0_i32 = arith.constant 0 : i32
    %c0_i32_0 = arith.constant 0 : i32
    %c0_i32_1 = arith.constant 0 : i32
    return %c0_i32, %c0_i32_0 : i32, i32
  }
}

</mosaic_0001>

<bundles_post_ra>
// kernel: lenet5_forward.3
= control target key start
LH: loop header
LB: loop body
LE: loop exit
PB: predicated region body
PF: predicated region fallthrough
CT: control target
= control target key end

     0   :  { %vm278_vm0 = vcmask 1043456   ;;  %vm279_vm1 = vcmask 1044480   ;;  %v4969_v0 = vmov 0.0   ;;  %v3637_v2 = vmov 65535   ;;  %s4965_s1 = inlined_call_operand.vmem [shape: bf16[25,6], index: 1, kind: input, shape index: {}]   ;;  %s4966_s0 = inlined_call_operand.vmem [shape: bf16[4,392,25], index: 0, kind: input, shape index: {}]   ;;  %s4967_s2 = inlined_call_operand.vmem [shape: f32[1,6], index: 2, kind: input, shape index: {}]   ;;  %s4968_s3 = inlined_call_operand.vmem [shape: bf16[392,6], index: 3, kind: output, shape index: {}]  }
   0x1   :  { %3016 = vmatprep.subr.bf16.mxu0 %v4969_v0  ;;  %3120 = vmatprep.subr.bf16.mxu1 %v4969_v0  ;;  %v3435_v1 = vld [vmem:[%s4965_s1] sm:$0xff]   ;;  %v280_v3 = vsel %vm278_vm0, 4294967295, %v3637_v2  ;;  %v3436_v4 = vld [vmem:[%s4965_s1 + $0x8] sm:$0x1f]   ;;  %vm3638_vm2 = vmmov 0   ;;  %vm202_vm3 = vcmask 203776  }
   0x2   :  { %3017 = vmatpush3.bf16.msra.mxu0 %v3435_v1  ;;  %3121 = vmatpush3.bf16.msra.mxu1 %v3435_v1  ;;  %v281_v5 = vsel %vm279_vm1, %v280_v3, 0  ;;  %v3437_v7 = vld [vmem:[%s4966_s0] sm:$0xff]   ;;  %v3439_v9 = vld [vmem:[%s4966_s0 + $0x8] sm:$0xff]   ;;  %v3441_v11 = vld [vmem:[%s4966_s0 + $0x10] sm:$0xff]   ;;  %vm2406_vm4 = vcmask 44032  }
   0x3   :  { %3018 = vmatprep.subr.bf16.mxu0 %v4969_v0  ;;  %3122 = vmatprep.subr.bf16.mxu1 %v4969_v0  ;;  %v283_v6 = vand.u32 %v3436_v4, %v281_v5  ;;  %v3438_v8 = vld [vmem:[%s4966_s0 + $0xc4] sm:$0xff]   ;;  %v3440_v10 = vld [vmem:[%s4966_s0 + $0xcc] sm:$0xff]   ;;  %v3442_v12 = vld [vmem:[%s4966_s0 + $0xd4] sm:$0xff]  }
   0x4   :  { %3020 = vmatprep.mubr.msk.bf16.mxu0 %vm3638_vm2, %v4969_v0  ;;  %3124 = vmatprep.mubr.msk.bf16.mxu1 %vm3638_vm2, %v4969_v0  ;;  %v3443_v13 = vld [vmem:[%s4966_s0 + $0x18] sm:$0xff]   ;;  %v3445_v15 = vld [vmem:[%s4966_s0 + $0x20] sm:$0xff]   ;;  %v3447_v17 = vld [vmem:[%s4966_s0 + $0x28] sm:$0xff]  }
   0x5   :  { %v3444_v14 = vld [vmem:[%s4966_s0 + $0xdc] sm:$0xff]   ;;  %v3446_v16 = vld [vmem:[%s4966_s0 + $0xe4] sm:$0xff]   ;;  %v3448_v18 = vld [vmem:[%s4966_s0 + $0xec] sm:$0xff]  }
   0x6   :  { %3019 = vmatpush3.bf16.msra.mxu0 %v283_v6  ;;  %3123 = vmatpush3.bf16.msra.mxu1 %v283_v6  ;;  %v3449_v19 = vld [vmem:[%s4966_s0 + $0x30] sm:$0xff]   ;;  %v3451_v21 = vld [vmem:[%s4966_s0 + $0x38] sm:$0xff]   ;;  %v3453_v23 = vld [vmem:[%s4966_s0 + $0x40] sm:$0xff]  }
   0x7   :  { %3224 = vmatprep.subr.bf16.mxu0 %v4969_v0  ;;  %3328 = vmatprep.subr.bf16.mxu1 %v4969_v0  ;;  %v3450_v20 = vld [vmem:[%s4966_s0 + $0xf4] sm:$0xff]   ;;  %v3452_v22 = vld [vmem:[%s4966_s0 + $0xfc] sm:$0xff]   ;;  %v3454_v24 = vld [vmem:[%s4966_s0 + $0x104] sm:$0xff]  }
   0x8   :  { %v3455_v25 = vld [vmem:[%s4966_s0 + $0x48] sm:$0xff]   ;;  %v3457_v27 = vld [vmem:[%s4966_s0 + $0x50] sm:$0xff]   ;;  %v3459_v29 = vld [vmem:[%s4966_s0 + $0x58] sm:$0xff]  }
   0x9   :  { %3021 = vmatmul.mubr.msk.bf16.vlgmr.msra.gmra.mrb[0].mxu0 %vm202_vm3, %v3437_v7  ;;  %3125 = vmatmul.mubr.msk.bf16.vlgmr.msra.gmra.mrb[0].mxu1 %vm202_vm3, %v3438_v8  ;;  %v3456_v26 = vld [vmem:[%s4966_s0 + $0x10c] sm:$0xff]   ;;  %v3458_v28 = vld [vmem:[%s4966_s0 + $0x114] sm:$0xff]   ;;  %v3460_v30 = vld [vmem:[%s4966_s0 + $0x11c] sm:$0xff]  }
   0xa   :  { %3225 = vmatpush3.bf16.msra.mxu0 %v3435_v1  ;;  %3329 = vmatpush3.bf16.msra.mxu1 %v3435_v1  ;;  %v3461_v31 = vld [vmem:[%s4966_s0 + $0x60] sm:$0xff]   ;;  %v3463_v33 = vld [vmem:[%s4966_s0 + $0x68] sm:$0xff]   ;;  %v3465_v35 = vld [vmem:[%s4966_s0 + $0x70] sm:$0xff]  }
   0xb   :  { %3024 = vmatprep.mubr.msk.bf16.mxu0 %vm3638_vm2, %v4969_v0  ;;  %3128 = vmatprep.mubr.msk.bf16.mxu1 %vm3638_vm2, %v4969_v0  ;;  %v3462_v32 = vld [vmem:[%s4966_s0 + $0x124] sm:$0xff]   ;;  %v3464_v34 = vld [vmem:[%s4966_s0 + $0x12c] sm:$0xff]   ;;  %v3466_v36 = vld [vmem:[%s4966_s0 + $0x134] sm:$0xff]  }
   0xc   :  { %3226 = vmatprep.subr.bf16.mxu0 %v4969_v0  ;;  %3330 = vmatprep.subr.bf16.mxu1 %v4969_v0  ;;  %v3467_v37 = vld [vmem:[%s4966_s0 + $0x78] sm:$0xff]   ;;  %v3469_v39 = vld [vmem:[%s4966_s0 + $0x80] sm:$0xff]   ;;  %v3471_v41 = vld [vmem:[%s4966_s0 + $0x88] sm:$0xff]  }
   0xd   :  { %v3468_v38 = vld [vmem:[%s4966_s0 + $0x13c] sm:$0xff]   ;;  %v3470_v40 = vld [vmem:[%s4966_s0 + $0x144] sm:$0xff]   ;;  %v3472_v42 = vld [vmem:[%s4966_s0 + $0x14c] sm:$0xff]  }
   0xe   :  { %3227 = vmatpush3.bf16.msra.mxu0 %v283_v6  ;;  %3331 = vmatpush3.bf16.msra.mxu1 %v283_v6  ;;  %v3473_v43 = vld [vmem:[%s4966_s0 + $0x90] sm:$0xff]   ;;  %v3475_v45 = vld [vmem:[%s4966_s0 + $0x98] sm:$0xff]   ;;  %v3477_v47 = vld [vmem:[%s4966_s0 + $0xa0] sm:$0xff]  }
   0xf   :  { %v3474_v44 = vld [vmem:[%s4966_s0 + $0x154] sm:$0xff]   ;;  %v3476_v46 = vld [vmem:[%s4966_s0 + $0x15c] sm:$0xff]   ;;  %v3478_v48 = vld [vmem:[%s4966_s0 + $0x164] sm:$0xff]  }
  0x10   :  { %v3479_v49 = vld [vmem:[%s4966_s0 + $0xa8] sm:$0xff]   ;;  %v3481_v51 = vld [vmem:[%s4966_s0 + $0xb0] sm:$0xff]   ;;  %v3483_v53 = vld [vmem:[%s4966_s0 + $0xb8] sm:$0xff]  }
  0x11   :  { %3025 = vmatmul.mubr.msk.bf16.gmra.mrb[4].mxu0 %vm202_vm3, %v3439_v9  ;;  %3129 = vmatmul.mubr.msk.bf16.gmra.mrb[4].mxu1 %vm202_vm3, %v3440_v10  ;;  %v3480_v50 = vld [vmem:[%s4966_s0 + $0x16c] sm:$0xff]   ;;  %v3482_v52 = vld [vmem:[%s4966_s0 + $0x174] sm:$0xff]   ;;  %v3484_v54 = vld [vmem:[%s4966_s0 + $0x17c] sm:$0xff]  }
  0x12   :  { %3028 = vmatprep.mubr.msk.bf16.mxu0 %vm3638_vm2, %v4969_v0  ;;  %3132 = vmatprep.mubr.msk.bf16.mxu1 %vm3638_vm2, %v4969_v0  ;;  %v3485_v55 = vld [vmem:[%s4966_s0 + $0xc0] ss:$0 sps:$4 sm:$0xff]   ;;  %v3486_v56 = vld [vmem:[%s4966_s0 + $0x184] ss:$0 sps:$4 sm:$0xff]   ;;  %v3487_v57 = vld [vmem:[%s4966_s0 + $0x188] sm:$0xff]  }
  0x13   :  { %v3488_v58 = vld [vmem:[%s4966_s0 + $0x24c] sm:$0xff]   ;;  %v3490_v60 = vld [vmem:[%s4966_s0 + $0x254] sm:$0xff]   ;;  %v3492_v4 = vld [vmem:[%s4966_s0 + $0x25c] sm:$0xff]  }
  0x14   :  { %v3489_v59 = vld [vmem:[%s4966_s0 + $0x190] sm:$0xff]   ;;  %v3491_v3 = vld [vmem:[%s4966_s0 + $0x198] sm:$0xff]  }
  0x19   :  { %3029 = vmatmul.mubr.msk.bf16.gmra.mrb[8].mxu0 %vm202_vm3, %v3441_v11  ;;  %3133 = vmatmul.mubr.msk.bf16.gmra.mrb[8].mxu1 %vm202_vm3, %v3442_v12 }
  0x1a   :  { %3032 = vmatprep.mubr.msk.bf16.mxu0 %vm3638_vm2, %v4969_v0  ;;  %3136 = vmatprep.mubr.msk.bf16.mxu1 %vm3638_vm2, %v4969_v0 }
  0x21   :  { %3033 = vmatmul.mubr.msk.bf16.gmra.mrb[12].mxu0 %vm202_vm3, %v3443_v13  ;;  %3137 = vmatmul.mubr.msk.bf16.gmra.mrb[12].mxu1 %vm202_vm3, %v3444_v14 }
  0x22   :  { %3036 = vmatprep.mubr.msk.bf16.mxu0 %vm3638_vm2, %v4969_v0  ;;  %3140 = vmatprep.mubr.msk.bf16.mxu1 %vm3638_vm2, %v4969_v0 }
  0x29   :  { %3037 = vmatmul.mubr.msk.bf16.gmra.mrb[16].mxu0 %vm202_vm3, %v3445_v15  ;;  %3141 = vmatmul.mubr.msk.bf16.gmra.mrb[16].mxu1 %vm202_vm3, %v3446_v16  ;;  %v3493_v15 = vld [vmem:[%s4966_s0 + $0x1a0] sm:$0xff]  }
  0x2a   :  { %3040 = vmatprep.mubr.msk.bf16.mxu0 %vm3638_vm2, %v4969_v0  ;;  %3144 = vmatprep.mubr.msk.bf16.mxu1 %vm3638_vm2, %v4969_v0  ;;  %v3494_v16 = vld [vmem:[%s4966_s0 + $0x264] sm:$0xff]  }
  0x31   :  { %3041 = vmatmul.mubr.msk.bf16.gmra.mrb[20].mxu0 %vm202_vm3, %v3447_v17  ;;  %3145 = vmatmul.mubr.msk.bf16.gmra.mrb[20].mxu1 %vm202_vm3, %v3448_v18 }
  0x32   :  { %3044 = vmatprep.mubr.msk.bf16.mxu0 %vm3638_vm2, %v4969_v0  ;;  %3148 = vmatprep.mubr.msk.bf16.mxu1 %vm3638_vm2, %v4969_v0 }
  0x39   :  { %3045 = vmatmul.mubr.msk.bf16.gmra.mrb[24].mxu0 %vm202_vm3, %v3449_v19  ;;  %3149 = vmatmul.mubr.msk.bf16.gmra.mrb[24].mxu1 %vm202_vm3, %v3450_v20 }
  0x3a   :  { %3048 = vmatprep.mubr.msk.bf16.mxu0 %vm3638_vm2, %v4969_v0  ;;  %3152 = vmatprep.mubr.msk.bf16.mxu1 %vm3638_vm2, %v4969_v0 }
  0x41   :  { %3049 = vmatmul.mubr.msk.bf16.gmra.mrb[28].mxu0 %vm202_vm3, %v3451_v21  ;;  %3153 = vmatmul.mubr.msk.bf16.gmra.mrb[28].mxu1 %vm202_vm3, %v3452_v22 }
  0x42   :  { %3052 = vmatprep.mubr.msk.bf16.mxu0 %vm3638_vm2, %v4969_v0  ;;  %3156 = vmatprep.mubr.msk.bf16.mxu1 %vm3638_vm2, %v4969_v0 }
  0x49   :  { %3053 = vmatmul.mubr.msk.bf16.gmra.mrb[32].mxu0 %vm202_vm3, %v3453_v23  ;;  %3157 = vmatmul.mubr.msk.bf16.gmra.mrb[32].mxu1 %vm202_vm3, %v3454_v24 }
  0x4a   :  { %3056 = vmatprep.mubr.msk.bf16.mxu0 %vm3638_vm2, %v4969_v0  ;;  %3160 = vmatprep.mubr.msk.bf16.mxu1 %vm3638_vm2, %v4969_v0 }
  0x51   :  { %3057 = vmatmul.mubr.msk.bf16.gmra.mrb[36].mxu0 %vm202_vm3, %v3455_v25  ;;  %3161 = vmatmul.mubr.msk.bf16.gmra.mrb[36].mxu1 %vm202_vm3, %v3456_v26 }
  0x52   :  { %3060 = vmatprep.mubr.msk.bf16.mxu0 %vm3638_vm2, %v4969_v0  ;;  %3164 = vmatprep.mubr.msk.bf16.mxu1 %vm3638_vm2, %v4969_v0 }
  0x59   :  { %3061 = vmatmul.mubr.msk.bf16.gmra.mrb[40].mxu0 %vm202_vm3, %v3457_v27  ;;  %3165 = vmatmul.mubr.msk.bf16.gmra.mrb[40].mxu1 %vm202_vm3, %v3458_v28  ;;  %v3495_v27 = vld [vmem:[%s4966_s0 + $0x1a8] sm:$0xff]  }
  0x5a   :  { %3064 = vmatprep.mubr.msk.bf16.mxu0 %vm3638_vm2, %v4969_v0  ;;  %3168 = vmatprep.mubr.msk.bf16.mxu1 %vm3638_vm2, %v4969_v0  ;;  %v3496_v28 = vld [vmem:[%s4966_s0 + $0x26c] sm:$0xff]  }
  0x61   :  { %3065 = vmatmul.mubr.msk.bf16.gmra.mrb[44].mxu0 %vm202_vm3, %v3459_v29  ;;  %3169 = vmatmul.mubr.msk.bf16.gmra.mrb[44].mxu1 %vm202_vm3, %v3460_v30 }
  0x62   :  { %3068 = vmatprep.mubr.msk.bf16.mxu0 %vm3638_vm2, %v4969_v0  ;;  %3172 = vmatprep.mubr.msk.bf16.mxu1 %vm3638_vm2, %v4969_v0 }
  0x69   :  { %3069 = vmatmul.mubr.msk.bf16.gmra.mrb[48].mxu0 %vm202_vm3, %v3461_v31  ;;  %3173 = vmatmul.mubr.msk.bf16.gmra.mrb[48].mxu1 %vm202_vm3, %v3462_v32 }
  0x6a   :  { %3072 = vmatprep.mubr.msk.bf16.mxu0 %vm3638_vm2, %v4969_v0  ;;  %3176 = vmatprep.mubr.msk.bf16.mxu1 %vm3638_vm2, %v4969_v0 }
  0x71   :  { %3073 = vmatmul.mubr.msk.bf16.gmra.mrb[52].mxu0 %vm202_vm3, %v3463_v33  ;;  %3177 = vmatmul.mubr.msk.bf16.gmra.mrb[52].mxu1 %vm202_vm3, %v3464_v34 }
  0x72   :  { %3076 = vmatprep.mubr.msk.bf16.mxu0 %vm3638_vm2, %v4969_v0  ;;  %3180 = vmatprep.mubr.msk.bf16.mxu1 %vm3638_vm2, %v4969_v0 }
  0x79   :  { %3077 = vmatmul.mubr.msk.bf16.gmra.mrb[56].mxu0 %vm202_vm3, %v3465_v35  ;;  %3181 = vmatmul.mubr.msk.bf16.gmra.mrb[56].mxu1 %vm202_vm3, %v3466_v36 }
  0x7a   :  { %3080 = vmatprep.mubr.msk.bf16.mxu0 %vm3638_vm2, %v4969_v0  ;;  %3184 = vmatprep.mubr.msk.bf16.mxu1 %vm3638_vm2, %v4969_v0 }
  0x81   :  { %3081 = vmatmul.mubr.msk.bf16.gmra.mrb[60].mxu0 %vm202_vm3, %v3467_v37  ;;  %3185 = vmatmul.mubr.msk.bf16.gmra.mrb[60].mxu1 %vm202_vm3, %v3468_v38 }
  0x82   :  { %3084 = vmatprep.mubr.msk.bf16.mxu0 %vm3638_vm2, %v4969_v0  ;;  %3188 = vmatprep.mubr.msk.bf16.mxu1 %vm3638_vm2, %v4969_v0 }
  0x89   :  { %3085 = vmatmul.mubr.msk.bf16.gmra.mrb[64].mxu0 %vm202_vm3, %v3469_v39  ;;  %3189 = vmatmul.mubr.msk.bf16.gmra.mrb[64].mxu1 %vm202_vm3, %v3470_v40  ;;  %v3497_v39 = vld [vmem:[%s4966_s0 + $0x1b0] sm:$0xff]  }
  0x8a   :  { %3088 = vmatprep.mubr.msk.bf16.mxu0 %vm3638_vm2, %v4969_v0  ;;  %3192 = vmatprep.mubr.msk.bf16.mxu1 %vm3638_vm2, %v4969_v0  ;;  %v3498_v40 = vld [vmem:[%s4966_s0 + $0x274] sm:$0xff]  }
  0x91   :  { %3089 = vmatmul.mubr.msk.bf16.gmra.mrb[68].mxu0 %vm202_vm3, %v3471_v41  ;;  %3193 = vmatmul.mubr.msk.bf16.gmra.mrb[68].mxu1 %vm202_vm3, %v3472_v42 }
  0x92   :  { %3092 = vmatprep.mubr.msk.bf16.mxu0 %vm3638_vm2, %v4969_v0  ;;  %3196 = vmatprep.mubr.msk.bf16.mxu1 %vm3638_vm2, %v4969_v0 }
  0x99   :  { %3093 = vmatmul.mubr.msk.bf16.gmra.mrb[72].mxu0 %vm202_vm3, %v3473_v43  ;;  %3197 = vmatmul.mubr.msk.bf16.gmra.mrb[72].mxu1 %vm202_vm3, %v3474_v44 }
  0x9a   :  { %3096 = vmatprep.mubr.msk.bf16.mxu0 %vm3638_vm2, %v4969_v0  ;;  %3200 = vmatprep.mubr.msk.bf16.mxu1 %vm3638_vm2, %v4969_v0 }
  0xa1   :  { %3097 = vmatmul.mubr.msk.bf16.gmra.mrb[76].mxu0 %vm202_vm3, %v3475_v45  ;;  %3201 = vmatmul.mubr.msk.bf16.gmra.mrb[76].mxu1 %vm202_vm3, %v3476_v46 }
  0xa2   :  { %3100 = vmatprep.mubr.msk.bf16.mxu0 %vm3638_vm2, %v4969_v0  ;;  %3204 = vmatprep.mubr.msk.bf16.mxu1 %vm3638_vm2, %v4969_v0 }
  0xa9   :  { %3101 = vmatmul.mubr.msk.bf16.gmra.mrb[80].mxu0 %vm202_vm3, %v3477_v47  ;;  %3205 = vmatmul.mubr.msk.bf16.gmra.mrb[80].mxu1 %vm202_vm3, %v3478_v48 }
  0xaa   :  { %3104 = vmatprep.mubr.msk.bf16.mxu0 %vm3638_vm2, %v4969_v0  ;;  %3208 = vmatprep.mubr.msk.bf16.mxu1 %vm3638_vm2, %v4969_v0 }
  0xb1   :  { %3105 = vmatmul.mubr.msk.bf16.gmra.mrb[84].mxu0 %vm202_vm3, %v3479_v49  ;;  %3209 = vmatmul.mubr.msk.bf16.gmra.mrb[84].mxu1 %vm202_vm3, %v3480_v50 }
  0xb2   :  { %3108 = vmatprep.mubr.msk.bf16.mxu0 %vm3638_vm2, %v4969_v0  ;;  %3212 = vmatprep.mubr.msk.bf16.mxu1 %vm3638_vm2, %v4969_v0 }
  0xb9   :  { %3109 = vmatmul.mubr.msk.bf16.gmra.mrb[88].mxu0 %vm202_vm3, %v3481_v51  ;;  %3213 = vmatmul.mubr.msk.bf16.gmra.mrb[88].mxu1 %vm202_vm3, %v3482_v52  ;;  %v3499_v51 = vld [vmem:[%s4966_s0 + $0x1b8] sm:$0xff]  }
  0xba   :  { %3112 = vmatprep.mubr.msk.bf16.mxu0 %vm3638_vm2, %v4969_v0  ;;  %3216 = vmatprep.mubr.msk.bf16.mxu1 %vm3638_vm2, %v4969_v0  ;;  %v3500_v52 = vld [vmem:[%s4966_s0 + $0x27c] sm:$0xff]  }
  0xc1   :  { %3113 = vmatmul.mubr.msk.bf16.gmra.mrb[92].mxu0 %vm202_vm3, %v3483_v53  ;;  %3217 = vmatmul.mubr.msk.bf16.gmra.mrb[92].mxu1 %vm202_vm3, %v3484_v54 }
  0xc2   :  { %3116 = vmatprep.mubr.msk.bf16.mxu0 %vm3638_vm2, %v4969_v0  ;;  %3220 = vmatprep.mubr.msk.bf16.mxu1 %vm3638_vm2, %v4969_v0 }
  0xc9   :  { %3117 = vmatmul.mubr.msk.bf16.gmra.mrb[96].mxu0 %vm202_vm3, %v3485_v55  ;;  %3221 = vmatmul.mubr.msk.bf16.gmra.mrb[96].mxu1 %vm202_vm3, %v3486_v56 }
  0xca   :  { %3228 = vmatprep.mubr.msk.bf16.mxu0 %vm3638_vm2, %v4969_v0  ;;  %3332 = vmatprep.mubr.msk.bf16.mxu1 %vm3638_vm2, %v4969_v0 }
  0xd1   :  { %3229 = vmatmul.mubr.msk.bf16.vlgmr.msra.gmra.mrb[100].mxu0 %vm202_vm3, %v3487_v57  ;;  %3333 = vmatmul.mubr.msk.bf16.vlgmr.msra.gmra.mrb[100].mxu1 %vm202_vm3, %v3488_v58 }
  0xd2   :  { %3232 = vmatprep.mubr.msk.bf16.mxu0 %vm3638_vm2, %v4969_v0  ;;  %3336 = vmatprep.mubr.msk.bf16.mxu1 %vm3638_vm2, %v4969_v0 }
  0xd9   :  { %3233 = vmatmul.mubr.msk.bf16.gmra.mrb[104].mxu0 %vm202_vm3, %v3489_v59  ;;  %3337 = vmatmul.mubr.msk.bf16.gmra.mrb[104].mxu1 %vm202_vm3, %v3490_v60 }
  0xda   :  { %3236 = vmatprep.mubr.msk.bf16.mxu0 %vm3638_vm2, %v4969_v0  ;;  %3340 = vmatprep.mubr.msk.bf16.mxu1 %vm3638_vm2, %v4969_v0 }
  0xdc   :  { %v4001_v61 = vpop.f32.mrb[0].mxu0  ;;  %v4003_v62 = vpop.f32.mrb[0].mxu1 }
  0xdd   :  { %v3022_v1 = vpop.f32.mrb[1].mxu0  ;;  %v3126_v2 = vpop.f32.mrb[1].mxu1 }
  0xde   :  { %v4013_v5 = vpop.f32.mrb[2].mxu0  ;;  %v4015_v6 = vpop.f32.mrb[2].mxu1 }
  0xdf   :  { %v3023_v8 = vpop.f32.mrb[3].mxu0  ;;  %v3127_v9 = vpop.f32.mrb[3].mxu1 }
  0xe1   :  { %3237 = vmatmul.mubr.msk.bf16.gmra.mrb[108].mxu0 %vm202_vm3, %v3491_v3  ;;  %3341 = vmatmul.mubr.msk.bf16.gmra.mrb[108].mxu1 %vm202_vm3, %v3492_v4  ;;  %v3501_v3 = vld [vmem:[%s4966_s0 + $0x1c0] sm:$0xff]  }
  0xe2   :  { %3240 = vmatprep.mubr.msk.bf16.mxu0 %vm3638_vm2, %v4969_v0  ;;  %3344 = vmatprep.mubr.msk.bf16.mxu1 %vm3638_vm2, %v4969_v0  ;;  %v3502_v4 = vld [vmem:[%s4966_s0 + $0x284] sm:$0xff]  }
  0xe4   :  { %v4025_v10 = vpop.f32.mrb[4].mxu0  ;;  %v4027_v11 = vpop.f32.mrb[4].mxu1 }
  0xe5   :  { %v3026_v13 = vpop.f32.mrb[5].mxu0  ;;  %v3130_v14 = vpop.f32.mrb[5].mxu1 }
  0xe6   :  { %v4037_v17 = vpop.f32.mrb[6].mxu0  ;;  %v4039_v18 = vpop.f32.mrb[6].mxu1 }
  0xe7   :  { %v3027_v20 = vpop.f32.mrb[7].mxu0  ;;  %v3131_v21 = vpop.f32.mrb[7].mxu1 }
  0xe9   :  { %3241 = vmatmul.mubr.msk.bf16.gmra.mrb[112].mxu0 %vm202_vm3, %v3493_v15  ;;  %3345 = vmatmul.mubr.msk.bf16.gmra.mrb[112].mxu1 %vm202_vm3, %v3494_v16 }
  0xea   :  { %3244 = vmatprep.mubr.msk.bf16.mxu0 %vm3638_vm2, %v4969_v0  ;;  %3348 = vmatprep.mubr.msk.bf16.mxu1 %vm3638_vm2, %v4969_v0 }
  0xec   :  { %v4049_v22 = vpop.f32.mrb[8].mxu0  ;;  %v4051_v23 = vpop.f32.mrb[8].mxu1 }
  0xed   :  { %v3030_v25 = vpop.f32.mrb[9].mxu0  ;;  %v3134_v26 = vpop.f32.mrb[9].mxu1 }
  0xee   :  { %v4061_v29 = vpop.f32.mrb[10].mxu0  ;;  %v4063_v30 = vpop.f32.mrb[10].mxu1 }
  0xef   :  { %v3031_v32 = vpop.f32.mrb[11].mxu0  ;;  %v3135_v33 = vpop.f32.mrb[11].mxu1 }
  0xf1   :  { %3245 = vmatmul.mubr.msk.bf16.gmra.mrb[116].mxu0 %vm202_vm3, %v3495_v27  ;;  %3349 = vmatmul.mubr.msk.bf16.gmra.mrb[116].mxu1 %vm202_vm3, %v3496_v28  ;;  %v3503_v27 = vld [vmem:[%s4966_s0 + $0x1c8] sm:$0xff]  }
  0xf2   :  { %3248 = vmatprep.mubr.msk.bf16.mxu0 %vm3638_vm2, %v4969_v0  ;;  %3352 = vmatprep.mubr.msk.bf16.mxu1 %vm3638_vm2, %v4969_v0  ;;  %v3504_v28 = vld [vmem:[%s4966_s0 + $0x28c] sm:$0xff]  }
  0xf4   :  { %v4073_v34 = vpop.f32.mrb[12].mxu0  ;;  %v4075_v35 = vpop.f32.mrb[12].mxu1 }
  0xf5   :  { %v3034_v37 = vpop.f32.mrb[13].mxu0  ;;  %v3138_v38 = vpop.f32.mrb[13].mxu1 }
  0xf6   :  { %v4085_v41 = vpop.f32.mrb[14].mxu0  ;;  %v4087_v42 = vpop.f32.mrb[14].mxu1 }
  0xf7   :  { %v3035_v44 = vpop.f32.mrb[15].mxu0  ;;  %v3139_v45 = vpop.f32.mrb[15].mxu1 }
  0xf9   :  { %3249 = vmatmul.mubr.msk.bf16.gmra.mrb[120].mxu0 %vm202_vm3, %v3497_v39  ;;  %3353 = vmatmul.mubr.msk.bf16.gmra.mrb[120].mxu1 %vm202_vm3, %v3498_v40 }
  0xfa   :  { %3252 = vmatprep.mubr.msk.bf16.mxu0 %vm3638_vm2, %v4969_v0  ;;  %3356 = vmatprep.mubr.msk.bf16.mxu1 %vm3638_vm2, %v4969_v0 }
  0xfc   :  { %v4097_v46 = vpop.f32.mrb[16].mxu0  ;;  %v4099_v47 = vpop.f32.mrb[16].mxu1 }
  0xfd   :  { %v3038_v49 = vpop.f32.mrb[17].mxu0  ;;  %v3142_v50 = vpop.f32.mrb[17].mxu1 }
  0xfe   :  { %v4109_v53 = vpop.f32.mrb[18].mxu0  ;;  %v4111_v54 = vpop.f32.mrb[18].mxu1 }
  0xff   :  { %v3039_v56 = vpop.f32.mrb[19].mxu0  ;;  %v3143_v57 = vpop.f32.mrb[19].mxu1 }
 0x101   :  { %3253 = vmatmul.mubr.msk.bf16.gmra.mrb[124].mxu0 %vm202_vm3, %v3499_v51  ;;  %3357 = vmatmul.mubr.msk.bf16.gmra.mrb[124].mxu1 %vm202_vm3, %v3500_v52  ;;  %v3505_v51 = vld [vmem:[%s4966_s0 + $0x1d0] sm:$0xff]  }
 0x102   :  { %3256 = vmatprep.mubr.msk.bf16.mxu0 %vm3638_vm2, %v4969_v0  ;;  %3360 = vmatprep.mubr.msk.bf16.mxu1 %vm3638_vm2, %v4969_v0  ;;  %v3506_v52 = vld [vmem:[%s4966_s0 + $0x294] sm:$0xff]  }
 0x104   :  { %v4121_v58 = vpop.f32.mrb[20].mxu0  ;;  %v4123_v59 = vpop.f32.mrb[20].mxu1 }
 0x105   :  { %v3042_v1 = vpop.f32.mrb[21].mxu0  ;;  %v3146_v2 = vpop.f32.mrb[21].mxu1 }
 0x106   :  { %v4133_v8 = vpop.f32.mrb[22].mxu0  ;;  %v4135_v9 = vpop.f32.mrb[22].mxu1 }
 0x107   :  { %v3043_v14 = vpop.f32.mrb[23].mxu0  ;;  %v3147_v15 = vpop.f32.mrb[23].mxu1 }
 0x109   :  { %3257 = vmatmul.mubr.msk.bf16.gmra.mrb[128].mxu0 %vm202_vm3, %v3501_v3  ;;  %3361 = vmatmul.mubr.msk.bf16.gmra.mrb[128].mxu1 %vm202_vm3, %v3502_v4 }
 0x10a   :  { %3260 = vmatprep.mubr.msk.bf16.mxu0 %vm3638_vm2, %v4969_v0  ;;  %3364 = vmatprep.mubr.msk.bf16.mxu1 %vm3638_vm2, %v4969_v0 }
 0x10c   :  { %v4145_v16 = vpop.f32.mrb[24].mxu0  ;;  %v4147_v20 = vpop.f32.mrb[24].mxu1 }
 0x10d   :  { %v3046_v25 = vpop.f32.mrb[25].mxu0  ;;  %v3150_v26 = vpop.f32.mrb[25].mxu1 }
 0x10e   :  { %v4157_v32 = vpop.f32.mrb[26].mxu0  ;;  %v4159_v33 = vpop.f32.mrb[26].mxu1 }
 0x10f   :  { %v3047_v38 = vpop.f32.mrb[27].mxu0  ;;  %v3151_v39 = vpop.f32.mrb[27].mxu1 }
 0x111   :  { %3261 = vmatmul.mubr.msk.bf16.gmra.mrb[132].mxu0 %vm202_vm3, %v3503_v27  ;;  %3365 = vmatmul.mubr.msk.bf16.gmra.mrb[132].mxu1 %vm202_vm3, %v3504_v28  ;;  %v3507_v27 = vld [vmem:[%s4966_s0 + $0x1d8] sm:$0xff]  }
 0x112   :  { %3264 = vmatprep.mubr.msk.bf16.mxu0 %vm3638_vm2, %v4969_v0  ;;  %3368 = vmatprep.mubr.msk.bf16.mxu1 %vm3638_vm2, %v4969_v0  ;;  %v3508_v28 = vld [vmem:[%s4966_s0 + $0x29c] sm:$0xff]  }
 0x114   :  { %v4169_v40 = vpop.f32.mrb[28].mxu0  ;;  %v4171_v44 = vpop.f32.mrb[28].mxu1 }
 0x115   :  { %v3050_v49 = vpop.f32.mrb[29].mxu0  ;;  %v3154_v50 = vpop.f32.mrb[29].mxu1 }
 0x116   :  { %v4181_v56 = vpop.f32.mrb[30].mxu0  ;;  %v4183_v57 = vpop.f32.mrb[30].mxu1 }
 0x117   :  { %v3051_v2 = vpop.f32.mrb[31].mxu0  ;;  %v3155_v3 = vpop.f32.mrb[31].mxu1 }
 0x119   :  { %3265 = vmatmul.mubr.msk.bf16.gmra.mrb[136].mxu0 %vm202_vm3, %v3505_v51  ;;  %3369 = vmatmul.mubr.msk.bf16.gmra.mrb[136].mxu1 %vm202_vm3, %v3506_v52 }
 0x11a   :  { %3268 = vmatprep.mubr.msk.bf16.mxu0 %vm3638_vm2, %v4969_v0  ;;  %3372 = vmatprep.mubr.msk.bf16.mxu1 %vm3638_vm2, %v4969_v0 }
 0x11c   :  { %v4193_v4 = vpop.f32.mrb[32].mxu0  ;;  %v4195_v14 = vpop.f32.mrb[32].mxu1 }
 0x11d   :  { %v3054_v25 = vpop.f32.mrb[33].mxu0  ;;  %v3158_v26 = vpop.f32.mrb[33].mxu1 }
 0x11e   :  { %v4205_v38 = vpop.f32.mrb[34].mxu0  ;;  %v4207_v39 = vpop.f32.mrb[34].mxu1 }
 0x11f   :  { %v3055_v50 = vpop.f32.mrb[35].mxu0  ;;  %v3159_v51 = vpop.f32.mrb[35].mxu1 }
 0x121   :  { %3269 = vmatmul.mubr.msk.bf16.gmra.mrb[140].mxu0 %vm202_vm3, %v3507_v27  ;;  %3373 = vmatmul.mubr.msk.bf16.gmra.mrb[140].mxu1 %vm202_vm3, %v3508_v28  ;;  %v3509_v27 = vld [vmem:[%s4966_s0 + $0x1e0] sm:$0xff]  }
 0x122   :  { %3272 = vmatprep.mubr.msk.bf16.mxu0 %vm3638_vm2, %v4969_v0  ;;  %3376 = vmatprep.mubr.msk.bf16.mxu1 %vm3638_vm2, %v4969_v0  ;;  %v3510_v28 = vld [vmem:[%s4966_s0 + $0x2a4] sm:$0xff]  }
 0x124   :  { %v4217_v52 = vpop.f32.mrb[36].mxu0  ;;  %v4219_v2 = vpop.f32.mrb[36].mxu1 }
 0x125   :  { %v3058_v25 = vpop.f32.mrb[37].mxu0  ;;  %v3162_v26 = vpop.f32.mrb[37].mxu1 }
 0x126   :  { %v4229_v50 = vpop.f32.mrb[38].mxu0  ;;  %v4231_v51 = vpop.f32.mrb[38].mxu1 }
 0x127   :  { %v3059_v15 = vpop.f32.mrb[39].mxu0  ;;  %v3163_v1 = vpop.f32.mrb[39].mxu1 }
 0x128   :  { %v3511_v1 = vld [vmem:[%s4966_s0 + $0x1e8] sm:$0xff]  }
 0x129   :  { %3273 = vmatmul.mubr.msk.bf16.gmra.mrb[144].mxu0 %vm202_vm3, %v3509_v27  ;;  %3377 = vmatmul.mubr.msk.bf16.gmra.mrb[144].mxu1 %vm202_vm3, %v3510_v28  ;;  %v3512_v27 = vld [vmem:[%s4966_s0 + $0x2ac] sm:$0xff]  }
 0x12a   :  { %3276 = vmatprep.mubr.msk.bf16.mxu0 %vm3638_vm2, %v4969_v0  ;;  %3380 = vmatprep.mubr.msk.bf16.mxu1 %vm3638_vm2, %v4969_v0 }
 0x12c   :  { %v4241_v25 = vpop.f32.mrb[40].mxu0  ;;  %v4243_v26 = vpop.f32.mrb[40].mxu1 }
 0x12d   :  { %v3062_v49 = vpop.f32.mrb[41].mxu0  ;;  %v3166_v15 = vpop.f32.mrb[41].mxu1 }
 0x12e   :  { %v4253_v28 = vpop.f32.mrb[42].mxu0  ;;  %v4255_v45 = vpop.f32.mrb[42].mxu1 }
 0x12f   :  { %v3063_v21 = vpop.f32.mrb[43].mxu0  ;;  %v3167_v13 = vpop.f32.mrb[43].mxu1 }
 0x130   :  { %v3513_v13 = vld [vmem:[%s4966_s0 + $0x1f0] sm:$0xff]  }
 0x131   :  { %3277 = vmatmul.mubr.msk.bf16.gmra.mrb[148].mxu0 %vm202_vm3, %v3511_v1  ;;  %3381 = vmatmul.mubr.msk.bf16.gmra.mrb[148].mxu1 %vm202_vm3, %v3512_v27  ;;  %v3514_v1 = vld [vmem:[%s4966_s0 + $0x2b4] sm:$0xff]  }
 0x132   :  { %3280 = vmatprep.mubr.msk.bf16.mxu0 %vm3638_vm2, %v4969_v0  ;;  %3384 = vmatprep.mubr.msk.bf16.mxu1 %vm3638_vm2, %v4969_v0 }
 0x134   :  { %v4265_v49 = vpop.f32.mrb[44].mxu0  ;;  %v4267_v15 = vpop.f32.mrb[44].mxu1 }
 0x135   :  { %v3066_v37 = vpop.f32.mrb[45].mxu0  ;;  %v3170_v21 = vpop.f32.mrb[45].mxu1 }
 0x136   :  { %v4277_v27 = vpop.f32.mrb[46].mxu0  ;;  %v4279_v60 = vpop.f32.mrb[46].mxu1 }
 0x137   :  { %v3067_v48 = vpop.f32.mrb[47].mxu0  ;;  %v3171_v43 = vpop.f32.mrb[47].mxu1 }
 0x138   :  { %v3515_v43 = vld [vmem:[%s4966_s0 + $0x1f8] sm:$0xff]  }
 0x139   :  { %3281 = vmatmul.mubr.msk.bf16.gmra.mrb[152].mxu0 %vm202_vm3, %v3513_v13  ;;  %3385 = vmatmul.mubr.msk.bf16.gmra.mrb[152].mxu1 %vm202_vm3, %v3514_v1  ;;  %v3516_v13 = vld [vmem:[%s4966_s0 + $0x2bc] sm:$0xff]  }
 0x13a   :  { %3284 = vmatprep.mubr.msk.bf16.mxu0 %vm3638_vm2, %v4969_v0  ;;  %3388 = vmatprep.mubr.msk.bf16.mxu1 %vm3638_vm2, %v4969_v0 }
 0x13c   :  { %v4289_v37 = vpop.f32.mrb[48].mxu0  ;;  %v4291_v21 = vpop.f32.mrb[48].mxu1 }
 0x13d   :  { %5021 = vst [vmem:[#allocation2_spill] sm:$0xff] %v4289_v37  ;;  %5022 = vst [vmem:[#allocation3_spill] sm:$0xff] %v4291_v21  ;;  %v3070_v55 = vpop.f32.mrb[49].mxu0  ;;  %v3174_v48 = vpop.f32.mrb[49].mxu1 }
 0x13e   :  { %v4301_v1 = vpop.f32.mrb[50].mxu0  ;;  %v4303_v36 = vpop.f32.mrb[50].mxu1 }
 0x13f   :  { %5023 = vst [vmem:[#allocation4_spill] sm:$0xff] %v4301_v1  ;;  %5024 = vst [vmem:[#allocation5_spill] sm:$0xff] %v4303_v36  ;;  %v3071_v24 = vpop.f32.mrb[51].mxu0  ;;  %v3175_v19 = vpop.f32.mrb[51].mxu1 }
 0x140   :  { %v3517_v19 = vld [vmem:[%s4966_s0 + $0x200] sm:$0xff]  }
 0x141   :  { %3285 = vmatmul.mubr.msk.bf16.gmra.mrb[156].mxu0 %vm202_vm3, %v3515_v43  ;;  %3389 = vmatmul.mubr.msk.bf16.gmra.mrb[156].mxu1 %vm202_vm3, %v3516_v13  ;;  %v3518_v43 = vld [vmem:[%s4966_s0 + $0x2c4] sm:$0xff]  }
 0x142   :  { %3288 = vmatprep.mubr.msk.bf16.mxu0 %vm3638_vm2, %v4969_v0  ;;  %3392 = vmatprep.mubr.msk.bf16.mxu1 %vm3638_vm2, %v4969_v0 }
 0x144   :  { %v4313_v55 = vpop.f32.mrb[52].mxu0  ;;  %v4315_v48 = vpop.f32.mrb[52].mxu1 }
 0x145   :  { %5025 = vst [vmem:[#allocation6_spill] sm:$0xff] %v4313_v55  ;;  %5026 = vst [vmem:[#allocation7_spill] sm:$0xff] %v4315_v48  ;;  %v3074_v31 = vpop.f32.mrb[53].mxu0  ;;  %v3178_v24 = vpop.f32.mrb[53].mxu1 }
 0x146   :  { %v4325_v13 = vpop.f32.mrb[54].mxu0  ;;  %v4327_v12 = vpop.f32.mrb[54].mxu1  ;;  %v5029_v31 = vmov 0.0  }
 0x147   :  { %5027 = vst [vmem:[#allocation8_spill] sm:$0xff] %v4325_v13  ;;  %5028 = vst [vmem:[#allocation9_spill] sm:$0xff] %v4327_v12  ;;  %v3075_v63 = vpop.f32.mrb[55].mxu0  ;;  %v3179_v0 = vpop.f32.mrb[55].mxu1 }
 0x148   :  { %v3519_v0 = vld [vmem:[%s4966_s0 + $0x208] sm:$0xff]  }
 0x149   :  { %3289 = vmatmul.mubr.msk.bf16.gmra.mrb[160].mxu0 %vm202_vm3, %v3517_v19  ;;  %3393 = vmatmul.mubr.msk.bf16.gmra.mrb[160].mxu1 %vm202_vm3, %v3518_v43  ;;  %v3520_v19 = vld [vmem:[%s4966_s0 + $0x2cc] sm:$0xff]  }
 0x14a   :  { %3292 = vmatprep.mubr.msk.bf16.mxu0 %vm3638_vm2, %v5029_v31  ;;  %3396 = vmatprep.mubr.msk.bf16.mxu1 %vm3638_vm2, %v5029_v31 }
 0x14c   :  { %v4337_v24 = vpop.f32.mrb[56].mxu0  ;;  %v4339_v3 = vpop.f32.mrb[56].mxu1 }
 0x14d   :  { %5030 = vst [vmem:[#allocation10_spill] sm:$0xff] %v4337_v24  ;;  %5031 = vst [vmem:[#allocation11_spill] sm:$0xff] %v4339_v3  ;;  %v3078_v7 = vpop.f32.mrb[57].mxu0  ;;  %v3182_v63 = vpop.f32.mrb[57].mxu1 }
 0x14e   :  { %v4349_v43 = vpop.f32.mrb[58].mxu0  ;;  %v4351_v12 = vpop.f32.mrb[58].mxu1 }
 0x14f   :  { %5032 = vst [vmem:[#allocation12_spill] sm:$0xff] %v4349_v43  ;;  %5033 = vst [vmem:[#allocation13_spill] sm:$0xff] %v4351_v12  ;;  %v3079_v55 = vpop.f32.mrb[59].mxu0  ;;  %v3183_v36 = vpop.f32.mrb[59].mxu1 }
 0x150   :  { %v3521_v36 = vld [vmem:[%s4966_s0 + $0x210] sm:$0xff]  }
 0x151   :  { %3293 = vmatmul.mubr.msk.bf16.gmra.mrb[164].mxu0 %vm202_vm3, %v3519_v0  ;;  %3397 = vmatmul.mubr.msk.bf16.gmra.mrb[164].mxu1 %vm202_vm3, %v3520_v19  ;;  %v3522_v0 = vld [vmem:[%s4966_s0 + $0x2d4] sm:$0xff]  }
 0x152   :  { %3296 = vmatprep.mubr.msk.bf16.mxu0 %vm3638_vm2, %v5029_v31  ;;  %3400 = vmatprep.mubr.msk.bf16.mxu1 %vm3638_vm2, %v5029_v31 }
 0x154   :  { %v4361_v7 = vpop.f32.mrb[60].mxu0  ;;  %v4363_v63 = vpop.f32.mrb[60].mxu1 }
 0x155   :  { %5034 = vst [vmem:[#allocation14_spill] sm:$0xff] %v4361_v7  ;;  %5035 = vst [vmem:[#allocation15_spill] sm:$0xff] %v4363_v63  ;;  %v3082_v13 = vpop.f32.mrb[61].mxu0  ;;  %v3186_v55 = vpop.f32.mrb[61].mxu1 }
 0x156   :  { %v4373_v19 = vpop.f32.mrb[62].mxu0  ;;  %v4375_v12 = vpop.f32.mrb[62].mxu1 }
 0x157   :  { %5036 = vst [vmem:[#allocation16_spill] sm:$0xff] %v4373_v19  ;;  %5037 = vst [vmem:[#allocation17_spill] sm:$0xff] %v4375_v12  ;;  %v3083_v3 = vpop.f32.mrb[63].mxu0  ;;  %v3187_v24 = vpop.f32.mrb[63].mxu1 }
 0x158   :  { %v3523_v24 = vld [vmem:[%s4966_s0 + $0x218] sm:$0xff]  }
 0x159   :  { %3297 = vmatmul.mubr.msk.bf16.gmra.mrb[168].mxu0 %vm202_vm3, %v3521_v36  ;;  %3401 = vmatmul.mubr.msk.bf16.gmra.mrb[168].mxu1 %vm202_vm3, %v3522_v0  ;;  %v3524_v36 = vld [vmem:[%s4966_s0 + $0x2dc] sm:$0xff]  }
 0x15a   :  { %3300 = vmatprep.mubr.msk.bf16.mxu0 %vm3638_vm2, %v5029_v31  ;;  %3404 = vmatprep.mubr.msk.bf16.mxu1 %vm3638_vm2, %v5029_v31 }
 0x15c   :  { %v4385_v13 = vpop.f32.mrb[64].mxu0  ;;  %v4387_v55 = vpop.f32.mrb[64].mxu1 }
 0x15d   :  { %5038 = vst [vmem:[#allocation18_spill] sm:$0xff] %v4385_v13  ;;  %5039 = vst [vmem:[#allocation19_spill] sm:$0xff] %v4387_v55  ;;  %v3086_v43 = vpop.f32.mrb[65].mxu0  ;;  %v3190_v3 = vpop.f32.mrb[65].mxu1 }
 0x15e   :  { %v4397_v0 = vpop.f32.mrb[66].mxu0  ;;  %v4399_v12 = vpop.f32.mrb[66].mxu1 }
 0x15f   :  { %5040 = vst [vmem:[#allocation20_spill] sm:$0xff] %v4397_v0  ;;  %5041 = vst [vmem:[#allocation21_spill] sm:$0xff] %v4399_v12  ;;  %v3087_v63 = vpop.f32.mrb[67].mxu0  ;;  %v3191_v7 = vpop.f32.mrb[67].mxu1 }
 0x160   :  { %v3525_v7 = vld [vmem:[%s4966_s0 + $0x220] sm:$0xff]  }
 0x161   :  { %3301 = vmatmul.mubr.msk.bf16.gmra.mrb[172].mxu0 %vm202_vm3, %v3523_v24  ;;  %3405 = vmatmul.mubr.msk.bf16.gmra.mrb[172].mxu1 %vm202_vm3, %v3524_v36  ;;  %v3526_v24 = vld [vmem:[%s4966_s0 + $0x2e4] sm:$0xff]  }
 0x162   :  { %3304 = vmatprep.mubr.msk.bf16.mxu0 %vm3638_vm2, %v5029_v31  ;;  %3408 = vmatprep.mubr.msk.bf16.mxu1 %vm3638_vm2, %v5029_v31 }
 0x164   :  { %v4409_v43 = vpop.f32.mrb[68].mxu0  ;;  %v4411_v3 = vpop.f32.mrb[68].mxu1 }
 0x165   :  { %5042 = vst [vmem:[#allocation22_spill] sm:$0xff] %v4409_v43  ;;  %5043 = vst [vmem:[#allocation23_spill] sm:$0xff] %v4411_v3  ;;  %v3090_v19 = vpop.f32.mrb[69].mxu0  ;;  %v3194_v63 = vpop.f32.mrb[69].mxu1 }
 0x166   :  { %v4421_v36 = vpop.f32.mrb[70].mxu0  ;;  %v4423_v12 = vpop.f32.mrb[70].mxu1 }
 0x167   :  { %5044 = vst [vmem:[#allocation24_spill] sm:$0xff] %v4421_v36  ;;  %5045 = vst [vmem:[#allocation25_spill] sm:$0xff] %v4423_v12  ;;  %v3091_v55 = vpop.f32.mrb[71].mxu0  ;;  %v3195_v13 = vpop.f32.mrb[71].mxu1 }
 0x168   :  { %v3527_v13 = vld [vmem:[%s4966_s0 + $0x228] sm:$0xff]  }
 0x169   :  { %3305 = vmatmul.mubr.msk.bf16.gmra.mrb[176].mxu0 %vm202_vm3, %v3525_v7  ;;  %3409 = vmatmul.mubr.msk.bf16.gmra.mrb[176].mxu1 %vm202_vm3, %v3526_v24  ;;  %v3528_v7 = vld [vmem:[%s4966_s0 + $0x2ec] sm:$0xff]  }
 0x16a   :  { %3308 = vmatprep.mubr.msk.bf16.mxu0 %vm3638_vm2, %v5029_v31  ;;  %3412 = vmatprep.mubr.msk.bf16.mxu1 %vm3638_vm2, %v5029_v31 }
 0x16c   :  { %v4433_v19 = vpop.f32.mrb[72].mxu0  ;;  %v4435_v63 = vpop.f32.mrb[72].mxu1 }
 0x16d   :  { %5046 = vst [vmem:[#allocation26_spill] sm:$0xff] %v4433_v19  ;;  %5047 = vst [vmem:[#allocation27_spill] sm:$0xff] %v4435_v63  ;;  %v3094_v0 = vpop.f32.mrb[73].mxu0  ;;  %v3198_v55 = vpop.f32.mrb[73].mxu1 }
 0x16e   :  { %v4445_v24 = vpop.f32.mrb[74].mxu0  ;;  %v4447_v12 = vpop.f32.mrb[74].mxu1 }
 0x16f   :  { %5048 = vst [vmem:[#allocation28_spill] sm:$0xff] %v4445_v24  ;;  %5049 = vst [vmem:[#allocation29_spill] sm:$0xff] %v4447_v12  ;;  %v3095_v3 = vpop.f32.mrb[75].mxu0  ;;  %v3199_v43 = vpop.f32.mrb[75].mxu1 }
 0x170   :  { %v3529_v43 = vld [vmem:[%s4966_s0 + $0x230] sm:$0xff]  }
 0x171   :  { %3309 = vmatmul.mubr.msk.bf16.gmra.mrb[180].mxu0 %vm202_vm3, %v3527_v13  ;;  %3413 = vmatmul.mubr.msk.bf16.gmra.mrb[180].mxu1 %vm202_vm3, %v3528_v7  ;;  %v3530_v13 = vld [vmem:[%s4966_s0 + $0x2f4] sm:$0xff]  }
 0x172   :  { %3312 = vmatprep.mubr.msk.bf16.mxu0 %vm3638_vm2, %v5029_v31  ;;  %3416 = vmatprep.mubr.msk.bf16.mxu1 %vm3638_vm2, %v5029_v31 }
 0x174   :  { %v4457_v0 = vpop.f32.mrb[76].mxu0  ;;  %v4459_v55 = vpop.f32.mrb[76].mxu1 }
 0x175   :  { %5050 = vst [vmem:[#allocation30_spill] sm:$0xff] %v4457_v0  ;;  %5051 = vst [vmem:[#allocation31_spill] sm:$0xff] %v4459_v55  ;;  %v3098_v36 = vpop.f32.mrb[77].mxu0  ;;  %v3202_v3 = vpop.f32.mrb[77].mxu1 }
 0x176   :  { %v4469_v7 = vpop.f32.mrb[78].mxu0  ;;  %v4471_v12 = vpop.f32.mrb[78].mxu1 }
 0x177   :  { %5052 = vst [vmem:[#allocation32_spill] sm:$0xff] %v4469_v7  ;;  %5053 = vst [vmem:[#allocation33_spill] sm:$0xff] %v4471_v12  ;;  %v3099_v63 = vpop.f32.mrb[79].mxu0  ;;  %v3203_v19 = vpop.f32.mrb[79].mxu1 }
 0x178   :  { %v3531_v19 = vld [vmem:[%s4966_s0 + $0x238] sm:$0xff]  }
 0x179   :  { %3313 = vmatmul.mubr.msk.bf16.gmra.mrb[184].mxu0 %vm202_vm3, %v3529_v43  ;;  %3417 = vmatmul.mubr.msk.bf16.gmra.mrb[184].mxu1 %vm202_vm3, %v3530_v13  ;;  %v3532_v43 = vld [vmem:[%s4966_s0 + $0x2fc] sm:$0xff]  }
 0x17a   :  { %3316 = vmatprep.mubr.msk.bf16.mxu0 %vm3638_vm2, %v5029_v31  ;;  %3420 = vmatprep.mubr.msk.bf16.mxu1 %vm3638_vm2, %v5029_v31 }
 0x17c   :  { %v4481_v36 = vpop.f32.mrb[80].mxu0  ;;  %v4483_v3 = vpop.f32.mrb[80].mxu1 }
 0x17d   :  { %5054 = vst [vmem:[#allocation34_spill] sm:$0xff] %v4481_v36  ;;  %5055 = vst [vmem:[#allocation35_spill] sm:$0xff] %v4483_v3  ;;  %v3102_v24 = vpop.f32.mrb[81].mxu0  ;;  %v3206_v63 = vpop.f32.mrb[81].mxu1 }
 0x17e   :  { %v4493_v13 = vpop.f32.mrb[82].mxu0  ;;  %v4495_v12 = vpop.f32.mrb[82].mxu1 }
 0x17f   :  { %5056 = vst [vmem:[#allocation36_spill] sm:$0xff] %v4493_v13  ;;  %5057 = vst [vmem:[#allocation37_spill] sm:$0xff] %v4495_v12  ;;  %v3103_v55 = vpop.f32.mrb[83].mxu0  ;;  %v3207_v0 = vpop.f32.mrb[83].mxu1 }
 0x180   :  { %v3533_v0 = vld [vmem:[%s4966_s0 + $0x240] sm:$0xff]  }
 0x181   :  { %3317 = vmatmul.mubr.msk.bf16.gmra.mrb[188].mxu0 %vm202_vm3, %v3531_v19  ;;  %3421 = vmatmul.mubr.msk.bf16.gmra.mrb[188].mxu1 %vm202_vm3, %v3532_v43  ;;  %v3534_v19 = vld [vmem:[%s4966_s0 + $0x304] sm:$0xff]  }
 0x182   :  { %3320 = vmatprep.mubr.msk.bf16.mxu0 %vm3638_vm2, %v5029_v31  ;;  %3424 = vmatprep.mubr.msk.bf16.mxu1 %vm3638_vm2, %v5029_v31 }
 0x184   :  { %v4505_v24 = vpop.f32.mrb[84].mxu0  ;;  %v4507_v63 = vpop.f32.mrb[84].mxu1 }
 0x185   :  { %5058 = vst [vmem:[#allocation38_spill] sm:$0xff] %v4505_v24  ;;  %5059 = vst [vmem:[#allocation39_spill] sm:$0xff] %v4507_v63  ;;  %v3106_v7 = vpop.f32.mrb[85].mxu0  ;;  %v3210_v55 = vpop.f32.mrb[85].mxu1 }
 0x186   :  { %v4517_v43 = vpop.f32.mrb[86].mxu0  ;;  %v4519_v12 = vpop.f32.mrb[86].mxu1 }
 0x187   :  { %5060 = vst [vmem:[#allocation40_spill] sm:$0xff] %v4517_v43  ;;  %5061 = vst [vmem:[#allocation41_spill] sm:$0xff] %v4519_v12  ;;  %v3107_v3 = vpop.f32.mrb[87].mxu0  ;;  %v3211_v36 = vpop.f32.mrb[87].mxu1 }
 0x188   :  { %v3535_v36 = vld [vmem:[%s4966_s0 + $0x248] ss:$0 sps:$4 sm:$0xff]  }
 0x189   :  { %3321 = vmatmul.mubr.msk.bf16.gmra.mrb[192].mxu0 %vm202_vm3, %v3533_v0  ;;  %3425 = vmatmul.mubr.msk.bf16.gmra.mrb[192].mxu1 %vm202_vm3, %v3534_v19  ;;  %v3536_v0 = vld [vmem:[%s4966_s0 + $0x30c] ss:$0 sps:$4 sm:$0xff]  }
 0x18a   :  { %3324 = vmatprep.mubr.msk.bf16.mxu0 %vm3638_vm2, %v5029_v31  ;;  %3428 = vmatprep.mubr.msk.bf16.mxu1 %vm3638_vm2, %v5029_v31 }
 0x18c   :  { %v4529_v7 = vpop.f32.mrb[88].mxu0  ;;  %v4531_v55 = vpop.f32.mrb[88].mxu1 }
 0x18d   :  { %5062 = vst [vmem:[#allocation42_spill] sm:$0xff] %v4529_v7  ;;  %5063 = vst [vmem:[#allocation43_spill] sm:$0xff] %v4531_v55  ;;  %v3110_v13 = vpop.f32.mrb[89].mxu0  ;;  %v3214_v3 = vpop.f32.mrb[89].mxu1 }
 0x18e   :  { %v4541_v19 = vpop.f32.mrb[90].mxu0  ;;  %v4543_v31 = vpop.f32.mrb[90].mxu1 }
 0x18f   :  { %5064 = vst [vmem:[#allocation44_spill] sm:$0xff] %v4541_v19  ;;  %5065 = vst [vmem:[#allocation45_spill] sm:$0xff] %v4543_v31  ;;  %v3111_v43 = vpop.f32.mrb[91].mxu0  ;;  %v3215_v63 = vpop.f32.mrb[91].mxu1 }
 0x190   :  { %v5072_v63 = vmax.f32 %v4001_v61, %v4003_v62 }
 0x191   :  { %3325 = vmatmul.mubr.msk.bf16.gmra.mrb[196].mxu0 %vm202_vm3, %v3535_v36  ;;  %3429 = vmatmul.mubr.msk.bf16.gmra.mrb[196].mxu1 %vm202_vm3, %v3536_v0 }
 0x194   :  { %v4549_v13 = vpop.f32.mrb[92].mxu0  ;;  %v4551_v3 = vpop.f32.mrb[92].mxu1 }
 0x195   :  { %5066 = vst [vmem:[#allocation46_spill] sm:$0xff] %v4549_v13  ;;  %5067 = vst [vmem:[#allocation47_spill] sm:$0xff] %v4551_v3  ;;  %v3114_v55 = vpop.f32.mrb[93].mxu0  ;;  %v3218_v7 = vpop.f32.mrb[93].mxu1 }
 0x196   :  { %v4555_v24 = vpop.f32.mrb[94].mxu0  ;;  %v4557_v1 = vpop.f32.mrb[94].mxu1 }
 0x197   :  { %5068 = vst [vmem:[#allocation48_spill] sm:$0xff] %v4555_v24  ;;  %5069 = vst [vmem:[#allocation49_spill] sm:$0xff] %v4557_v1  ;;  %v3115_v43 = vpop.f32.mrb[95].mxu0  ;;  %v3219_v36 = vpop.f32.mrb[95].mxu1  ;;  %v4573_v24 = vld [vmem:[%s4967_s2] ss:$0 sm:$0xff] }
 0x19c   :  { %v4561_v12 = vpop.f32.mrb[96].mxu0  ;;  %v4563_v0 = vpop.f32.mrb[96].mxu1 }
 0x19d   :  { %5070 = vst [vmem:[#allocation50_spill] sm:$0xff] %v4561_v12  ;;  %5071 = vst [vmem:[#allocation51_spill] sm:$0xff] %v4563_v0  ;;  %v3118_v19 = vpop.f32.mrb[97].mxu0  ;;  %v3222_v48 = vpop.f32.mrb[97].mxu1 }
 0x19e   :  { %v514_v55 = vpop.f32.mrb[98].mxu0  ;;  %v994_v7 = vpop.f32.mrb[98].mxu1 }
 0x19f   :  { %v3119_v3 = vpop.f32.mrb[99].mxu0  ;;  %v3223_v13 = vpop.f32.mrb[99].mxu1 }
 0x1a0   :  { %v5073_v3 = vmax.f32 %v4013_v5, %v4015_v6 }
 0x1a4   :  { %v1328_v21 = vpop.f32.mrb[100].mxu0  ;;  %v1857_v37 = vpop.f32.mrb[100].mxu1 }
 0x1a5   :  { %v1526_v43 = vmax.f32 %v5072_v63, %v1328_v21  ;;  %v3230_v36 = vpop.f32.mrb[101].mxu0  ;;  %v3334_v1 = vpop.f32.mrb[101].mxu1  ;;  %v5074_v63 = vmax.f32 %v4025_v10, %v4027_v11 }
 0x1a6   :  { %v1331_v31 = vpop.f32.mrb[102].mxu0  ;;  %v1860_v19 = vpop.f32.mrb[102].mxu1 }
 0x1a7   :  { %v2055_v48 = vmax.f32 %v1526_v43, %v1857_v37  ;;  %v1527_v13 = vmax.f32 %v5073_v3, %v1331_v31  ;;  %v3231_v55 = vpop.f32.mrb[103].mxu0  ;;  %v3335_v7 = vpop.f32.mrb[103].mxu1  ;;  %v5075_v31 = vmax.f32 %v4037_v17, %v4039_v18 }
 0x1a9   :  { %v2111_v0 = vadd.f32 %v4573_v24, %v2055_v48  ;;  %v2056_v61 = vmax.f32 %v1527_v13, %v1860_v19 }
 0x1ab   :  { %3537 = vtanh.f32 %v2111_v0  ;;  %v2112_v62 = vadd.f32 %v4573_v24, %v2056_v61  ;;  %v5076_v61 = vmax.f32 %v4049_v22, %v4051_v23 }
 0x1ac   :  { %v1336_v21 = vpop.f32.mrb[104].mxu0  ;;  %v1865_v1 = vpop.f32.mrb[104].mxu1 }
 0x1ad   :  { %3539 = vtanh.f32 %v2112_v62  ;;  %v1528_v36 = vmax.f32 %v5074_v63, %v1336_v21  ;;  %v3234_v37 = vpop.f32.mrb[105].mxu0  ;;  %v3338_v43 = vpop.f32.mrb[105].mxu1 }
 0x1ae   :  { %v1339_v12 = vpop.f32.mrb[106].mxu0  ;;  %v1868_v5 = vpop.f32.mrb[106].mxu1  ;;  %v5077_v37 = vmax.f32 %v4061_v29, %v4063_v30 }
 0x1af   :  { %v2057_v6 = vmax.f32 %v1528_v36, %v1865_v1  ;;  %v1529_v48 = vmax.f32 %v5075_v31, %v1339_v12  ;;  %v3235_v19 = vpop.f32.mrb[107].mxu0  ;;  %v3339_v0 = vpop.f32.mrb[107].mxu1 }
 0x1b0   :  { %v5078_v0 = vmax.f32 %v4073_v34, %v4075_v35 }
 0x1b1   :  { %v2113_v3 = vadd.f32 %v4573_v24, %v2057_v6  ;;  %v2058_v13 = vmax.f32 %v1529_v48, %v1868_v5 }
 0x1b3   :  { %3541 = vtanh.f32 %v2113_v3  ;;  %v2114_v55 = vadd.f32 %v4573_v24, %v2058_v13 }
 0x1b4   :  { %v1344_v7 = vpop.f32.mrb[108].mxu0  ;;  %v1873_v10 = vpop.f32.mrb[108].mxu1 }
 0x1b5   :  { %v3538_v11 = vpop.eup %3537  ;;  %3543 = vtanh.f32 %v2114_v55  ;;  %v1530_v62 = vmax.f32 %v5076_v61, %v1344_v7  ;;  %v3238_v21 = vpop.f32.mrb[109].mxu0 }
 0x1b6   :  { %v3342_v17 = vpop.f32.mrb[109].mxu1  ;;  %v2859_v12 = vpack.c.bf16 %v3538_v11, %v3538_v11  ;;  %v1347_v18 = vpop.f32.mrb[110].mxu0  ;;  %v5079_v21 = vmax.f32 %v4085_v41, %v4087_v42 }
 0x1b7   :  { %v1876_v1 = vpop.f32.mrb[110].mxu1  ;;  %v3540_v63 = vpop.eup %3539  ;;  %v2059_v36 = vmax.f32 %v1530_v62, %v1873_v10  ;;  %v1531_v43 = vmax.f32 %v5077_v37, %v1347_v18  ;;  %v5080_v37 = vmax.f32 %v4097_v46, %v4099_v47 }
 0x1b8   :  { %v3239_v5 = vpop.f32.mrb[111].mxu0  ;;  %v3343_v6 = vpop.f32.mrb[111].mxu1  ;;  %2407 = vst.msk [vmem:[%s4968_s3] sm:$0xf] %vm2406_vm4, %v2859_v12  ;;  %v2860_v22 = vpack.c.bf16 %v3540_v63, %v3540_v63 }
 0x1b9   :  { %v2115_v23 = vadd.f32 %v4573_v24, %v2059_v36  ;;  %v2060_v31 = vmax.f32 %v1531_v43, %v1876_v1 }
 0x1ba   :  { %2408 = vst.msk [vmem:[%s4968_s3 + $0x4] sm:$0xf] %vm2406_vm4, %v2860_v22 }
 0x1bb   :  { %3545 = vtanh.f32 %v2115_v23  ;;  %v2116_v29 = vadd.f32 %v4573_v24, %v2060_v31 }
 0x1bc   :  { %v1352_v30 = vpop.f32.mrb[112].mxu0  ;;  %v1881_v48 = vpop.f32.mrb[112].mxu1 }
 0x1bd   :  { %v3542_v19 = vpop.eup %3541  ;;  %3547 = vtanh.f32 %v2116_v29  ;;  %v1532_v3 = vmax.f32 %v5078_v0, %v1352_v30  ;;  %v3242_v13 = vpop.f32.mrb[113].mxu0 }
 0x1be   :  { %v3346_v55 = vpop.f32.mrb[113].mxu1  ;;  %v2861_v7 = vpack.c.bf16 %v3542_v19, %v3542_v19  ;;  %v1355_v10 = vpop.f32.mrb[114].mxu0 }
 0x1bf   :  { %v1884_v11 = vpop.f32.mrb[114].mxu1  ;;  %v3544_v61 = vpop.eup %3543  ;;  %v2061_v62 = vmax.f32 %v1532_v3, %v1881_v48  ;;  %v1533_v17 = vmax.f32 %v5079_v21, %v1355_v10  ;;  %v5081_v48 = vmax.f32 %v4109_v53, %v4111_v54  ;;  %v5082_v10 = vmax.f32 %v4121_v58, %v4123_v59 }
 0x1c0   :  { %v3243_v12 = vpop.f32.mrb[115].mxu0  ;;  %v3347_v18 = vpop.f32.mrb[115].mxu1  ;;  %2409 = vst.msk [vmem:[%s4968_s3 + $0x8] sm:$0xf] %vm2406_vm4, %v2861_v7  ;;  %v2862_v34 = vpack.c.bf16 %v3544_v61, %v3544_v61 }
 0x1c1   :  { %v2117_v35 = vadd.f32 %v4573_v24, %v2061_v62  ;;  %v2062_v1 = vmax.f32 %v1533_v17, %v1884_v11 }
 0x1c2   :  { %2410 = vst.msk [vmem:[%s4968_s3 + $0xc] sm:$0xf] %vm2406_vm4, %v2862_v34 }
 0x1c3   :  { %3549 = vtanh.f32 %v2117_v35  ;;  %v2118_v41 = vadd.f32 %v4573_v24, %v2062_v1  ;;  %v5083_v35 = vmax.f32 %v4133_v8, %v4135_v9 }
 0x1c4   :  { %v1360_v42 = vpop.f32.mrb[116].mxu0  ;;  %v1889_v63 = vpop.f32.mrb[116].mxu1 }
 0x1c5   :  { %v3546_v36 = vpop.eup %3545  ;;  %3551 = vtanh.f32 %v2118_v41  ;;  %v1534_v43 = vmax.f32 %v5080_v37, %v1360_v42  ;;  %v3246_v5 = vpop.f32.mrb[117].mxu0 }
 0x1c6   :  { %v3350_v6 = vpop.f32.mrb[117].mxu1  ;;  %v2863_v22 = vpack.c.bf16 %v3546_v36, %v3546_v36  ;;  %v1363_v23 = vpop.f32.mrb[118].mxu0 }
 0x1c7   :  { %v1892_v31 = vpop.f32.mrb[118].mxu1  ;;  %v3548_v29 = vpop.eup %3547  ;;  %v2063_v30 = vmax.f32 %v1534_v43, %v1889_v63  ;;  %v1535_v19 = vmax.f32 %v5081_v48, %v1363_v23  ;;  %v5084_v43 = vmax.f32 %v4145_v16, %v4147_v20 }
 0x1c8   :  { %v3247_v0 = vpop.f32.mrb[119].mxu0  ;;  %v3351_v3 = vpop.f32.mrb[119].mxu1  ;;  %2411 = vst.msk [vmem:[%s4968_s3 + $0x10] sm:$0xf] %vm2406_vm4, %v2863_v22  ;;  %v2864_v46 = vpack.c.bf16 %v3548_v29, %v3548_v29 }
 0x1c9   :  { %v2119_v47 = vadd.f32 %v4573_v24, %v2063_v30  ;;  %v2064_v13 = vmax.f32 %v1535_v19, %v1892_v31  ;;  %v5085_v19 = vmax.f32 %v4157_v32, %v4159_v33 }
 0x1ca   :  { %2412 = vst.msk [vmem:[%s4968_s3 + $0x14] sm:$0xf] %vm2406_vm4, %v2864_v46 }
 0x1cb   :  { %3553 = vtanh.f32 %v2119_v47  ;;  %v2120_v53 = vadd.f32 %v4573_v24, %v2064_v13 }
 0x1cc   :  { %v1368_v54 = vpop.f32.mrb[120].mxu0  ;;  %v1897_v55 = vpop.f32.mrb[120].mxu1 }
 0x1cd   :  { %v3550_v7 = vpop.eup %3549  ;;  %3555 = vtanh.f32 %v2120_v53  ;;  %v1536_v11 = vmax.f32 %v5082_v10, %v1368_v54  ;;  %v3250_v61 = vpop.f32.mrb[121].mxu0  ;;  %v5086_v54 = vmax.f32 %v4169_v40, %v4171_v44 }
 0x1ce   :  { %v3354_v62 = vpop.f32.mrb[121].mxu1  ;;  %v2865_v21 = vpack.c.bf16 %v3550_v7, %v3550_v7  ;;  %v1371_v17 = vpop.f32.mrb[122].mxu0 }
 0x1cf   :  { %v1900_v12 = vpop.f32.mrb[122].mxu1  ;;  %v3552_v18 = vpop.eup %3551  ;;  %v2065_v34 = vmax.f32 %v1536_v11, %v1897_v55  ;;  %v1537_v1 = vmax.f32 %v5083_v35, %v1371_v17 }
 0x1d0   :  { %v3251_v41 = vpop.f32.mrb[123].mxu0  ;;  %v3355_v42 = vpop.f32.mrb[123].mxu1  ;;  %2413 = vst.msk [vmem:[%s4968_s3 + $0x18] sm:$0xf] %vm2406_vm4, %v2865_v21  ;;  %v2866_v58 = vpack.c.bf16 %v3552_v18, %v3552_v18 }
 0x1d1   :  { %v2121_v59 = vadd.f32 %v4573_v24, %v2065_v34  ;;  %v2066_v63 = vmax.f32 %v1537_v1, %v1900_v12  ;;  %v5087_v12 = vmax.f32 %v4181_v56, %v4183_v57 }
 0x1d2   :  { %2414 = vst.msk [vmem:[%s4968_s3 + $0x1c] sm:$0xf] %vm2406_vm4, %v2866_v58  ;;  %v5088_v58 = vmax.f32 %v4193_v4, %v4195_v14 }
 0x1d3   :  { %3557 = vtanh.f32 %v2121_v59  ;;  %v2122_v8 = vadd.f32 %v4573_v24, %v2066_v63 }
 0x1d4   :  { %v1376_v9 = vpop.f32.mrb[124].mxu0  ;;  %v1905_v36 = vpop.f32.mrb[124].mxu1 }
 0x1d5   :  { %v3554_v37 = vpop.eup %3553  ;;  %3559 = vtanh.f32 %v2122_v8  ;;  %v1538_v5 = vmax.f32 %v5084_v43, %v1376_v9  ;;  %v3254_v6 = vpop.f32.mrb[125].mxu0 }
 0x1d6   :  { %v3358_v22 = vpop.f32.mrb[125].mxu1  ;;  %v2867_v23 = vpack.c.bf16 %v3554_v37, %v3554_v37  ;;  %v1379_v31 = vpop.f32.mrb[126].mxu0  ;;  %v5089_v6 = vmax.f32 %v4205_v38, %v4207_v39 }
 0x1d7   :  { %v1908_v29 = vpop.f32.mrb[126].mxu1  ;;  %v3556_v30 = vpop.eup %3555  ;;  %v2067_v48 = vmax.f32 %v1538_v5, %v1905_v36  ;;  %v1539_v0 = vmax.f32 %v5085_v19, %v1379_v31  ;;  %v5090_v19 = vmax.f32 %v4217_v52, %v4219_v2 }
 0x1d8   :  { %v3255_v3 = vpop.f32.mrb[127].mxu0  ;;  %v3359_v46 = vpop.f32.mrb[127].mxu1  ;;  %2415 = vst.msk [vmem:[%s4968_s3 + $0x20] sm:$0xf] %vm2406_vm4, %v2867_v23  ;;  %v2868_v16 = vpack.c.bf16 %v3556_v30, %v3556_v30 }
 0x1d9   :  { %v2123_v20 = vadd.f32 %v4573_v24, %v2067_v48  ;;  %v2068_v47 = vmax.f32 %v1539_v0, %v1908_v29 }
 0x1da   :  { %2416 = vst.msk [vmem:[%s4968_s3 + $0x24] sm:$0xf] %vm2406_vm4, %v2868_v16 }
 0x1db   :  { %3561 = vtanh.f32 %v2123_v20  ;;  %v2124_v32 = vadd.f32 %v4573_v24, %v2068_v47 }
 0x1dc   :  { %v1384_v33 = vpop.f32.mrb[128].mxu0  ;;  %v1913_v13 = vpop.f32.mrb[128].mxu1 }
 0x1dd   :  { %v3558_v53 = vpop.eup %3557  ;;  %3563 = vtanh.f32 %v2124_v32  ;;  %v1540_v55 = vmax.f32 %v5086_v54, %v1384_v33  ;;  %v3258_v7 = vpop.f32.mrb[129].mxu0 }
 0x1de   :  { %v3362_v10 = vpop.f32.mrb[129].mxu1  ;;  %v2869_v11 = vpack.c.bf16 %v3558_v53, %v3558_v53  ;;  %v1387_v61 = vpop.f32.mrb[130].mxu0 }
 0x1df   :  { %v1916_v62 = vpop.f32.mrb[130].mxu1  ;;  %v3560_v21 = vpop.eup %3559  ;;  %v2069_v17 = vmax.f32 %v1540_v55, %v1913_v13  ;;  %v1541_v18 = vmax.f32 %v5087_v12, %v1387_v61  ;;  %v5091_v13 = vmax.f32 %v4229_v50, %v4231_v51  ;;  %v5092_v61 = vmax.f32 %v4241_v25, %v4243_v26 }
 0x1e0   :  { %v3259_v34 = vpop.f32.mrb[131].mxu0  ;;  %v3363_v35 = vpop.f32.mrb[131].mxu1  ;;  %2417 = vst.msk [vmem:[%s4968_s3 + $0x28] sm:$0xf] %vm2406_vm4, %v2869_v11  ;;  %v2870_v40 = vpack.c.bf16 %v3560_v21, %v3560_v21 }
 0x1e1   :  { %v2125_v44 = vadd.f32 %v4573_v24, %v2069_v17  ;;  %v2070_v1 = vmax.f32 %v1541_v18, %v1916_v62 }
 0x1e2   :  { %2418 = vst.msk [vmem:[%s4968_s3 + $0x2c] sm:$0xf] %vm2406_vm4, %v2870_v40 }
 0x1e3   :  { %3565 = vtanh.f32 %v2125_v44  ;;  %v2126_v56 = vadd.f32 %v4573_v24, %v2070_v1  ;;  %v5093_v44 = vmax.f32 %v4253_v28, %v4255_v45 }
 0x1e4   :  { %v1392_v57 = vpop.f32.mrb[132].mxu0  ;;  %v1921_v41 = vpop.f32.mrb[132].mxu1 }
 0x1e5   :  { %v3562_v42 = vpop.eup %3561  ;;  %3567 = vtanh.f32 %v2126_v56  ;;  %v1542_v59 = vmax.f32 %v5088_v58, %v1392_v57  ;;  %v3262_v63 = vpop.f32.mrb[133].mxu0 }
 0x1e6   :  { %v3366_v8 = vpop.f32.mrb[133].mxu1  ;;  %v2871_v9 = vpack.c.bf16 %v3562_v42, %v3562_v42  ;;  %v1395_v36 = vpop.f32.mrb[134].mxu0 }
 0x1e7   :  { %v1924_v37 = vpop.f32.mrb[134].mxu1  ;;  %v3564_v43 = vpop.eup %3563  ;;  %v2071_v5 = vmax.f32 %v1542_v59, %v1921_v41  ;;  %v1543_v22 = vmax.f32 %v5089_v6, %v1395_v36  ;;  %v5094_v59 = vmax.f32 %v4265_v49, %v4267_v15 }
 0x1e8   :  { %v3263_v23 = vpop.f32.mrb[135].mxu0  ;;  %v3367_v31 = vpop.f32.mrb[135].mxu1  ;;  %2419 = vst.msk [vmem:[%s4968_s3 + $0x30] sm:$0xf] %vm2406_vm4, %v2871_v9  ;;  %v2872_v4 = vpack.c.bf16 %v3564_v43, %v3564_v43 }
 0x1e9   :  { %v2127_v14 = vadd.f32 %v4573_v24, %v2071_v5  ;;  %v2072_v29 = vmax.f32 %v1543_v22, %v1924_v37  ;;  %v5095_v22 = vmax.f32 %v4277_v27, %v4279_v60 }
 0x1ea   :  { %2420 = vst.msk [vmem:[%s4968_s3 + $0x34] sm:$0xf] %vm2406_vm4, %v2872_v4 }
 0x1eb   :  { %3569 = vtanh.f32 %v2127_v14  ;;  %v2128_v38 = vadd.f32 %v4573_v24, %v2072_v29 }
 0x1ec   :  { %v1400_v39 = vpop.f32.mrb[136].mxu0  ;;  %v1929_v30 = vpop.f32.mrb[136].mxu1 }
 0x1ed   :  { %v3566_v48 = vpop.eup %3565  ;;  %3571 = vtanh.f32 %v2128_v38  ;;  %v1544_v0 = vmax.f32 %v5090_v19, %v1400_v39  ;;  %v3266_v3 = vpop.f32.mrb[137].mxu0  ;;  %v5096_v39 = vld [vmem:[#allocation2_spill] sm:$0xff] }
 0x1ee   :  { %v3370_v46 = vpop.f32.mrb[137].mxu1  ;;  %v2873_v16 = vpack.c.bf16 %v3566_v48, %v3566_v48  ;;  %v1403_v20 = vpop.f32.mrb[138].mxu0 }
 0x1ef   :  { %v1932_v47 = vpop.f32.mrb[138].mxu1  ;;  %v3568_v32 = vpop.eup %3567  ;;  %v2073_v33 = vmax.f32 %v1544_v0, %v1929_v30  ;;  %v1545_v53 = vmax.f32 %v5091_v13, %v1403_v20  ;;  %v5097_v30 = vld [vmem:[#allocation3_spill] sm:$0xff]  ;;  %v5100_v13 = vld [vmem:[#allocation5_spill] sm:$0xff] }
 0x1f0   :  { %v3267_v54 = vpop.f32.mrb[139].mxu0  ;;  %v3371_v55 = vpop.f32.mrb[139].mxu1  ;;  %2421 = vst.msk [vmem:[%s4968_s3 + $0x38] sm:$0xf] %vm2406_vm4, %v2873_v16  ;;  %v2874_v52 = vpack.c.bf16 %v3568_v32, %v3568_v32  ;;  %v5098_v48 = vmax.f32 %v5096_v39, %v5097_v30 }
 0x1f1   :  { %v2129_v2 = vadd.f32 %v4573_v24, %v2073_v33  ;;  %v2074_v7 = vmax.f32 %v1545_v53, %v1932_v47  ;;  %v5099_v33 = vld [vmem:[#allocation4_spill] sm:$0xff] }
 0x1f2   :  { %2422 = vst.msk [vmem:[%s4968_s3 + $0x3c] sm:$0xf] %vm2406_vm4, %v2874_v52  ;;  %v5101_v53 = vmax.f32 %v5099_v33, %v5100_v13 }
 0x1f3   :  { %3573 = vtanh.f32 %v2129_v2  ;;  %v2130_v50 = vadd.f32 %v4573_v24, %v2074_v7 }
 0x1f4   :  { %v1408_v51 = vpop.f32.mrb[140].mxu0  ;;  %v1937_v10 = vpop.f32.mrb[140].mxu1 }
 0x1f5   :  { %v3570_v11 = vpop.eup %3569  ;;  %3575 = vtanh.f32 %v2130_v50  ;;  %v1546_v62 = vmax.f32 %v5092_v61, %v1408_v51  ;;  %v3270_v21 = vpop.f32.mrb[141].mxu0 }
 0x1f6   :  { %v3374_v17 = vpop.f32.mrb[141].mxu1  ;;  %v2875_v12 = vpack.c.bf16 %v3570_v11, %v3570_v11  ;;  %v1411_v18 = vpop.f32.mrb[142].mxu0  ;;  %v5103_v21 = vld [vmem:[#allocation7_spill] sm:$0xff] }
 0x1f7   :  { %v1940_v34 = vpop.f32.mrb[142].mxu1  ;;  %v3572_v35 = vpop.eup %3571  ;;  %v2075_v40 = vmax.f32 %v1546_v62, %v1937_v10  ;;  %v1547_v1 = vmax.f32 %v5093_v44, %v1411_v18  ;;  %v5102_v62 = vld [vmem:[#allocation6_spill] sm:$0xff] }
 0x1f8   :  { %v3271_v56 = vpop.f32.mrb[143].mxu0  ;;  %v3375_v57 = vpop.f32.mrb[143].mxu1  ;;  %2423 = vst.msk [vmem:[%s4968_s3 + $0x40] sm:$0xf] %vm2406_vm4, %v2875_v12  ;;  %v2876_v25 = vpack.c.bf16 %v3572_v35, %v3572_v35  ;;  %v5104_v17 = vmax.f32 %v5102_v62, %v5103_v21 }
 0x1f9   :  { %v2131_v26 = vadd.f32 %v4573_v24, %v2075_v40  ;;  %v2076_v41 = vmax.f32 %v1547_v1, %v1940_v34  ;;  %v5105_v57 = vld [vmem:[#allocation8_spill] sm:$0xff] }
 0x1fa   :  { %2424 = vst.msk [vmem:[%s4968_s3 + $0x44] sm:$0xf] %vm2406_vm4, %v2876_v25  ;;  %v5106_v25 = vld [vmem:[#allocation9_spill] sm:$0xff] }
 0x1fb   :  { %3577 = vtanh.f32 %v2131_v26  ;;  %v2132_v45 = vadd.f32 %v4573_v24, %v2076_v41  ;;  %v5107_v26 = vmax.f32 %v5105_v57, %v5106_v25 }
 0x1fc   :  { %v1416_v28 = vpop.f32.mrb[144].mxu0  ;;  %v1945_v42 = vpop.f32.mrb[144].mxu1 }
 0x1fd   :  { %v3574_v58 = vpop.eup %3573  ;;  %3579 = vtanh.f32 %v2132_v45  ;;  %v1548_v63 = vmax.f32 %v5094_v59, %v1416_v28  ;;  %v3274_v8 = vpop.f32.mrb[145].mxu0 }
 0x1fe   :  { %v3378_v9 = vpop.f32.mrb[145].mxu1  ;;  %v2877_v36 = vpack.c.bf16 %v3574_v58, %v3574_v58  ;;  %v1419_v37 = vpop.f32.mrb[146].mxu0 }
 0x1ff   :  { %v1948_v43 = vpop.f32.mrb[146].mxu1  ;;  %v3576_v5 = vpop.eup %3575  ;;  %v2077_v6 = vmax.f32 %v1548_v63, %v1945_v42  ;;  %v1549_v23 = vmax.f32 %v5095_v22, %v1419_v37  ;;  %v5108_v37 = vld [vmem:[#allocation10_spill] sm:$0xff] }
 0x200   :  { %v3275_v31 = vpop.f32.mrb[147].mxu0  ;;  %v3379_v4 = vpop.f32.mrb[147].mxu1  ;;  %2425 = vst.msk [vmem:[%s4968_s3 + $0x48] sm:$0xf] %vm2406_vm4, %v2877_v36  ;;  %v2878_v49 = vpack.c.bf16 %v3576_v5, %v3576_v5 }
 0x201   :  { %v2133_v15 = vadd.f32 %v4573_v24, %v2077_v6  ;;  %v2078_v14 = vmax.f32 %v1549_v23, %v1948_v43  ;;  %v5109_v43 = vld [vmem:[#allocation11_spill] sm:$0xff] }
 0x202   :  { %2426 = vst.msk [vmem:[%s4968_s3 + $0x4c] sm:$0xf] %vm2406_vm4, %v2878_v49  ;;  %v5110_v5 = vmax.f32 %v5108_v37, %v5109_v43 }
 0x203   :  { %3581 = vtanh.f32 %v2133_v15  ;;  %v2134_v60 = vadd.f32 %v4573_v24, %v2078_v14 }
 0x204   :  { %v1424_v27 = vpop.f32.mrb[148].mxu0  ;;  %v1953_v29 = vpop.f32.mrb[148].mxu1 }
 0x205   :  { %v3578_v38 = vpop.eup %3577  ;;  %3583 = vtanh.f32 %v2134_v60  ;;  %v1550_v19 = vmax.f32 %v5098_v48, %v1424_v27  ;;  %v3278_v0 = vpop.f32.mrb[149].mxu0  ;;  %v5111_v60 = vld [vmem:[#allocation12_spill] sm:$0xff]  ;;  %v5112_v27 = vld [vmem:[#allocation13_spill] sm:$0xff] }
 0x206   :  { %v3382_v3 = vpop.f32.mrb[149].mxu1  ;;  %v2879_v46 = vpack.c.bf16 %v3578_v38, %v3578_v38  ;;  %v1427_v16 = vpop.f32.mrb[150].mxu0 }
 0x207   :  { %v1956_v20 = vpop.f32.mrb[150].mxu1  ;;  %v3580_v47 = vpop.eup %3579  ;;  %v2079_v32 = vmax.f32 %v1550_v19, %v1953_v29  ;;  %v1551_v54 = vmax.f32 %v5101_v53, %v1427_v16  ;;  %v5113_v29 = vmax.f32 %v5111_v60, %v5112_v27 }
 0x208   :  { %v3279_v55 = vpop.f32.mrb[151].mxu0  ;;  %v3383_v52 = vpop.f32.mrb[151].mxu1  ;;  %2427 = vst.msk [vmem:[%s4968_s3 + $0x50] sm:$0xf] %vm2406_vm4, %v2879_v46  ;;  %v2880_v2 = vpack.c.bf16 %v3580_v47, %v3580_v47  ;;  %v5114_v47 = vld [vmem:[#allocation14_spill] sm:$0xff] }
 0x209   :  { %v2135_v7 = vadd.f32 %v4573_v24, %v2079_v32  ;;  %v2080_v50 = vmax.f32 %v1551_v54, %v1956_v20  ;;  %v5115_v32 = vld [vmem:[#allocation15_spill] sm:$0xff] }
 0x20a   :  { %2428 = vst.msk [vmem:[%s4968_s3 + $0x54] sm:$0xf] %vm2406_vm4, %v2880_v2  ;;  %v5116_v33 = vmax.f32 %v5114_v47, %v5115_v32 }
 0x20b   :  { %3585 = vtanh.f32 %v2135_v7  ;;  %v2136_v51 = vadd.f32 %v4573_v24, %v2080_v50 }
 0x20c   :  { %v1432_v10 = vpop.f32.mrb[152].mxu0  ;;  %v1961_v11 = vpop.f32.mrb[152].mxu1 }
 0x20d   :  { %v3582_v61 = vpop.eup %3581  ;;  %3587 = vtanh.f32 %v2136_v51  ;;  %v1552_v12 = vmax.f32 %v5104_v17, %v1432_v10  ;;  %v3282_v18 = vpop.f32.mrb[153].mxu0  ;;  %v5117_v51 = vld [vmem:[#allocation16_spill] sm:$0xff]  ;;  %v5118_v10 = vld [vmem:[#allocation17_spill] sm:$0xff] }
 0x20e   :  { %v3386_v34 = vpop.f32.mrb[153].mxu1  ;;  %v2881_v35 = vpack.c.bf16 %v3582_v61, %v3582_v61  ;;  %v1435_v40 = vpop.f32.mrb[154].mxu0 }
 0x20f   :  { %v1964_v44 = vpop.f32.mrb[154].mxu1  ;;  %v3584_v1 = vpop.eup %3583  ;;  %v2081_v56 = vmax.f32 %v1552_v12, %v1961_v11  ;;  %v1553_v41 = vmax.f32 %v5107_v26, %v1435_v40  ;;  %v5119_v11 = vmax.f32 %v5117_v51, %v5118_v10 }
 0x210   :  { %v3283_v45 = vpop.f32.mrb[155].mxu0  ;;  %v3387_v28 = vpop.f32.mrb[155].mxu1  ;;  %2429 = vst.msk [vmem:[%s4968_s3 + $0x58] sm:$0xf] %vm2406_vm4, %v2881_v35  ;;  %v2882_v42 = vpack.c.bf16 %v3584_v1, %v3584_v1  ;;  %v5120_v1 = vld [vmem:[#allocation18_spill] sm:$0xff] }
 0x211   :  { %v2137_v58 = vadd.f32 %v4573_v24, %v2081_v56  ;;  %v2082_v59 = vmax.f32 %v1553_v41, %v1964_v44  ;;  %v5121_v56 = vld [vmem:[#allocation19_spill] sm:$0xff] }
 0x212   :  { %2430 = vst.msk [vmem:[%s4968_s3 + $0x5c] sm:$0xf] %vm2406_vm4, %v2882_v42  ;;  %v5122_v57 = vmax.f32 %v5120_v1, %v5121_v56 }
 0x213   :  { %3589 = vtanh.f32 %v2137_v58  ;;  %v2138_v63 = vadd.f32 %v4573_v24, %v2082_v59 }
 0x214   :  { %v1440_v8 = vpop.f32.mrb[156].mxu0  ;;  %v1969_v9 = vpop.f32.mrb[156].mxu1 }
 0x215   :  { %v3586_v36 = vpop.eup %3585  ;;  %3591 = vtanh.f32 %v2138_v63  ;;  %v1554_v6 = vmax.f32 %v5110_v5, %v1440_v8  ;;  %v3286_v22 = vpop.f32.mrb[157].mxu0  ;;  %v5123_v63 = vld [vmem:[#allocation20_spill] sm:$0xff]  ;;  %v5124_v8 = vld [vmem:[#allocation21_spill] sm:$0xff] }
 0x216   :  { %v3390_v23 = vpop.f32.mrb[157].mxu1  ;;  %v2883_v31 = vpack.c.bf16 %v3586_v36, %v3586_v36  ;;  %v1443_v4 = vpop.f32.mrb[158].mxu0 }
 0x217   :  { %v1972_v49 = vpop.f32.mrb[158].mxu1  ;;  %v3588_v15 = vpop.eup %3587  ;;  %v2083_v14 = vmax.f32 %v1554_v6, %v1969_v9  ;;  %v1555_v38 = vmax.f32 %v5113_v29, %v1443_v4  ;;  %v5125_v9 = vmax.f32 %v5123_v63, %v5124_v8 }
 0x218   :  { %v3287_v39 = vpop.f32.mrb[159].mxu0  ;;  %v3391_v30 = vpop.f32.mrb[159].mxu1  ;;  %2431 = vst.msk [vmem:[%s4968_s3 + $0x60] sm:$0xf] %vm2406_vm4, %v2883_v31  ;;  %v2884_v48 = vpack.c.bf16 %v3588_v15, %v3588_v15  ;;  %v5126_v15 = vld [vmem:[#allocation22_spill] sm:$0xff] }
 0x219   :  { %v2139_v19 = vadd.f32 %v4573_v24, %v2083_v14  ;;  %v2084_v0 = vmax.f32 %v1555_v38, %v1972_v49  ;;  %v5127_v14 = vld [vmem:[#allocation23_spill] sm:$0xff] }
 0x21a   :  { %2432 = vst.msk [vmem:[%s4968_s3 + $0x64] sm:$0xf] %vm2406_vm4, %v2884_v48  ;;  %v5128_v60 = vmax.f32 %v5126_v15, %v5127_v14 }
 0x21b   :  { %3593 = vtanh.f32 %v2139_v19  ;;  %v2140_v3 = vadd.f32 %v4573_v24, %v2084_v0 }
 0x21c   :  { %v1448_v46 = vpop.f32.mrb[160].mxu0  ;;  %v1977_v16 = vpop.f32.mrb[160].mxu1 }
 0x21d   :  { %v3590_v20 = vpop.eup %3589  ;;  %3595 = vtanh.f32 %v2140_v3  ;;  %v1556_v13 = vmax.f32 %v5116_v33, %v1448_v46  ;;  %v3290_v53 = vpop.f32.mrb[161].mxu0  ;;  %v5129_v3 = vld [vmem:[#allocation24_spill] sm:$0xff]  ;;  %v5130_v46 = vld [vmem:[#allocation25_spill] sm:$0xff] }
 0x21e   :  { %v3394_v54 = vpop.f32.mrb[161].mxu1  ;;  %v2885_v55 = vpack.c.bf16 %v3590_v20, %v3590_v20  ;;  %v1451_v52 = vpop.f32.mrb[162].mxu0 }
 0x21f   :  { %v1980_v2 = vpop.f32.mrb[162].mxu1  ;;  %v3592_v7 = vpop.eup %3591  ;;  %v2085_v50 = vmax.f32 %v1556_v13, %v1977_v16  ;;  %v1557_v61 = vmax.f32 %v5119_v11, %v1451_v52  ;;  %v5131_v16 = vmax.f32 %v5129_v3, %v5130_v46 }
 0x220   :  { %v3291_v62 = vpop.f32.mrb[163].mxu0  ;;  %v3395_v21 = vpop.f32.mrb[163].mxu1  ;;  %2433 = vst.msk [vmem:[%s4968_s3 + $0x68] sm:$0xf] %vm2406_vm4, %v2885_v55  ;;  %v2886_v17 = vpack.c.bf16 %v3592_v7, %v3592_v7  ;;  %v5132_v7 = vld [vmem:[#allocation26_spill] sm:$0xff] }
 0x221   :  { %v2141_v12 = vadd.f32 %v4573_v24, %v2085_v50  ;;  %v2086_v18 = vmax.f32 %v1557_v61, %v1980_v2  ;;  %v5133_v50 = vld [vmem:[#allocation27_spill] sm:$0xff] }
 0x222   :  { %2434 = vst.msk [vmem:[%s4968_s3 + $0x6c] sm:$0xf] %vm2406_vm4, %v2886_v17  ;;  %v5134_v51 = vmax.f32 %v5132_v7, %v5133_v50 }
 0x223   :  { %3597 = vtanh.f32 %v2141_v12  ;;  %v2142_v34 = vadd.f32 %v4573_v24, %v2086_v18 }
 0x224   :  { %v1456_v35 = vpop.f32.mrb[164].mxu0  ;;  %v1985_v40 = vpop.f32.mrb[164].mxu1 }
 0x225   :  { %v3594_v44 = vpop.eup %3593  ;;  %3599 = vtanh.f32 %v2142_v34  ;;  %v1558_v25 = vmax.f32 %v5122_v57, %v1456_v35  ;;  %v3294_v26 = vpop.f32.mrb[165].mxu0  ;;  %v5135_v34 = vld [vmem:[#allocation28_spill] sm:$0xff]  ;;  %v5136_v35 = vld [vmem:[#allocation29_spill] sm:$0xff] }
 0x226   :  { %v3398_v41 = vpop.f32.mrb[165].mxu1  ;;  %v2887_v45 = vpack.c.bf16 %v3594_v44, %v3594_v44  ;;  %v1459_v28 = vpop.f32.mrb[166].mxu0 }
 0x227   :  { %v1988_v42 = vpop.f32.mrb[166].mxu1  ;;  %v3596_v58 = vpop.eup %3595  ;;  %v2087_v59 = vmax.f32 %v1558_v25, %v1985_v40  ;;  %v1559_v36 = vmax.f32 %v5125_v9, %v1459_v28  ;;  %v5137_v40 = vmax.f32 %v5135_v34, %v5136_v35 }
 0x228   :  { %v3295_v37 = vpop.f32.mrb[167].mxu0  ;;  %v3399_v43 = vpop.f32.mrb[167].mxu1  ;;  %2435 = vst.msk [vmem:[%s4968_s3 + $0x70] sm:$0xf] %vm2406_vm4, %v2887_v45  ;;  %v2888_v5 = vpack.c.bf16 %v3596_v58, %v3596_v58  ;;  %v5138_v58 = vld [vmem:[#allocation30_spill] sm:$0xff] }
 0x229   :  { %v2143_v6 = vadd.f32 %v4573_v24, %v2087_v59  ;;  %v2088_v22 = vmax.f32 %v1559_v36, %v1988_v42  ;;  %v5139_v59 = vld [vmem:[#allocation31_spill] sm:$0xff] }
 0x22a   :  { %2436 = vst.msk [vmem:[%s4968_s3 + $0x74] sm:$0xf] %vm2406_vm4, %v2888_v5  ;;  %v5140_v63 = vmax.f32 %v5138_v58, %v5139_v59 }
 0x22b   :  { %3601 = vtanh.f32 %v2143_v6  ;;  %v2144_v23 = vadd.f32 %v4573_v24, %v2088_v22 }
 0x22c   :  { %v1464_v31 = vpop.f32.mrb[168].mxu0  ;;  %v1993_v4 = vpop.f32.mrb[168].mxu1 }
 0x22d   :  { %v3598_v49 = vpop.eup %3597  ;;  %3603 = vtanh.f32 %v2144_v23  ;;  %v1560_v27 = vmax.f32 %v5128_v60, %v1464_v31  ;;  %v3298_v29 = vpop.f32.mrb[169].mxu0  ;;  %v5141_v23 = vld [vmem:[#allocation32_spill] sm:$0xff]  ;;  %v5142_v31 = vld [vmem:[#allocation33_spill] sm:$0xff] }
 0x22e   :  { %v3402_v38 = vpop.f32.mrb[169].mxu1  ;;  %v2889_v39 = vpack.c.bf16 %v3598_v49, %v3598_v49  ;;  %v1467_v30 = vpop.f32.mrb[170].mxu0 }
 0x22f   :  { %v1996_v48 = vpop.f32.mrb[170].mxu1  ;;  %v3600_v19 = vpop.eup %3599  ;;  %v2089_v0 = vmax.f32 %v1560_v27, %v1993_v4  ;;  %v1561_v20 = vmax.f32 %v5131_v16, %v1467_v30  ;;  %v5143_v4 = vmax.f32 %v5141_v23, %v5142_v31 }
 0x230   :  { %v3299_v47 = vpop.f32.mrb[171].mxu0  ;;  %v3403_v32 = vpop.f32.mrb[171].mxu1  ;;  %2437 = vst.msk [vmem:[%s4968_s3 + $0x78] sm:$0xf] %vm2406_vm4, %v2889_v39  ;;  %v2890_v33 = vpack.c.bf16 %v3600_v19, %v3600_v19  ;;  %v5144_v19 = vld [vmem:[#allocation34_spill] sm:$0xff] }
 0x231   :  { %v2145_v13 = vadd.f32 %v4573_v24, %v2089_v0  ;;  %v2090_v53 = vmax.f32 %v1561_v20, %v1996_v48  ;;  %v5145_v0 = vld [vmem:[#allocation35_spill] sm:$0xff] }
 0x232   :  { %2438 = vst.msk [vmem:[%s4968_s3 + $0x7c] sm:$0xf] %vm2406_vm4, %v2890_v33  ;;  %v5146_v3 = vmax.f32 %v5144_v19, %v5145_v0 }
 0x233   :  { %3605 = vtanh.f32 %v2145_v13  ;;  %v2146_v54 = vadd.f32 %v4573_v24, %v2090_v53 }
 0x234   :  { %v1472_v55 = vpop.f32.mrb[172].mxu0  ;;  %v2001_v52 = vpop.f32.mrb[172].mxu1 }
 0x235   :  { %v3602_v2 = vpop.eup %3601  ;;  %3607 = vtanh.f32 %v2146_v54  ;;  %v1562_v10 = vmax.f32 %v5134_v51, %v1472_v55  ;;  %v3302_v11 = vpop.f32.mrb[173].mxu0  ;;  %v5147_v54 = vld [vmem:[#allocation36_spill] sm:$0xff]  ;;  %v5148_v55 = vld [vmem:[#allocation37_spill] sm:$0xff] }
 0x236   :  { %v3406_v61 = vpop.f32.mrb[173].mxu1  ;;  %v2891_v62 = vpack.c.bf16 %v3602_v2, %v3602_v2  ;;  %v1475_v21 = vpop.f32.mrb[174].mxu0 }
 0x237   :  { %v2004_v17 = vpop.f32.mrb[174].mxu1  ;;  %v3604_v12 = vpop.eup %3603  ;;  %v2091_v18 = vmax.f32 %v1562_v10, %v2001_v52  ;;  %v1563_v44 = vmax.f32 %v5137_v40, %v1475_v21  ;;  %v5149_v52 = vmax.f32 %v5147_v54, %v5148_v55 }
 0x238   :  { %v3303_v1 = vpop.f32.mrb[175].mxu0  ;;  %v3407_v56 = vpop.f32.mrb[175].mxu1  ;;  %2439 = vst.msk [vmem:[%s4968_s3 + $0x80] sm:$0xf] %vm2406_vm4, %v2891_v62  ;;  %v2892_v57 = vpack.c.bf16 %v3604_v12, %v3604_v12  ;;  %v5150_v12 = vld [vmem:[#allocation38_spill] sm:$0xff] }
 0x239   :  { %v2147_v25 = vadd.f32 %v4573_v24, %v2091_v18  ;;  %v2092_v26 = vmax.f32 %v1563_v44, %v2004_v17  ;;  %v5151_v18 = vld [vmem:[#allocation39_spill] sm:$0xff] }
 0x23a   :  { %2440 = vst.msk [vmem:[%s4968_s3 + $0x84] sm:$0xf] %vm2406_vm4, %v2892_v57  ;;  %v5152_v34 = vmax.f32 %v5150_v12, %v5151_v18 }
 0x23b   :  { %3609 = vtanh.f32 %v2147_v25  ;;  %v2148_v41 = vadd.f32 %v4573_v24, %v2092_v26 }
 0x23c   :  { %v1480_v45 = vpop.f32.mrb[176].mxu0  ;;  %v2009_v28 = vpop.f32.mrb[176].mxu1 }
 0x23d   :  { %v3606_v42 = vpop.eup %3605  ;;  %3611 = vtanh.f32 %v2148_v41  ;;  %v1564_v8 = vmax.f32 %v5140_v63, %v1480_v45  ;;  %v3306_v9 = vpop.f32.mrb[177].mxu0  ;;  %v5153_v41 = vld [vmem:[#allocation40_spill] sm:$0xff]  ;;  %v5154_v45 = vld [vmem:[#allocation41_spill] sm:$0xff] }
 0x23e   :  { %v3410_v36 = vpop.f32.mrb[177].mxu1  ;;  %v2893_v37 = vpack.c.bf16 %v3606_v42, %v3606_v42  ;;  %v1483_v43 = vpop.f32.mrb[178].mxu0 }
 0x23f   :  { %v2012_v5 = vpop.f32.mrb[178].mxu1  ;;  %v3608_v6 = vpop.eup %3607  ;;  %v2093_v22 = vmax.f32 %v1564_v8, %v2009_v28  ;;  %v1565_v49 = vmax.f32 %v5143_v4, %v1483_v43  ;;  %v5155_v28 = vmax.f32 %v5153_v41, %v5154_v45  ;;  %v5169_v41 = vld [vmem:[#allocation51_spill] sm:$0xff] }
 0x240   :  { %v3307_v15 = vpop.f32.mrb[179].mxu0  ;;  %v3411_v14 = vpop.f32.mrb[179].mxu1  ;;  %2441 = vst.msk [vmem:[%s4968_s3 + $0x88] sm:$0xf] %vm2406_vm4, %v2893_v37  ;;  %v2894_v60 = vpack.c.bf16 %v3608_v6, %v3608_v6  ;;  %v5156_v6 = vld [vmem:[#allocation42_spill] sm:$0xff] }
 0x241   :  { %v2149_v27 = vadd.f32 %v4573_v24, %v2093_v22  ;;  %v2094_v29 = vmax.f32 %v1565_v49, %v2012_v5  ;;  %v5157_v22 = vld [vmem:[#allocation43_spill] sm:$0xff] }
 0x242   :  { %2442 = vst.msk [vmem:[%s4968_s3 + $0x8c] sm:$0xf] %vm2406_vm4, %v2894_v60  ;;  %v5158_v23 = vmax.f32 %v5156_v6, %v5157_v22 }
 0x243   :  { %3613 = vtanh.f32 %v2149_v27  ;;  %v2150_v38 = vadd.f32 %v4573_v24, %v2094_v29 }
 0x244   :  { %v1488_v39 = vpop.f32.mrb[180].mxu0  ;;  %v2017_v30 = vpop.f32.mrb[180].mxu1 }
 0x245   :  { %v3610_v48 = vpop.eup %3609  ;;  %3615 = vtanh.f32 %v2150_v38  ;;  %v1566_v46 = vmax.f32 %v5146_v3, %v1488_v39  ;;  %v3310_v16 = vpop.f32.mrb[181].mxu0  ;;  %v5159_v38 = vld [vmem:[#allocation44_spill] sm:$0xff]  ;;  %v5160_v39 = vld [vmem:[#allocation45_spill] sm:$0xff] }
 0x246   :  { %v3414_v20 = vpop.f32.mrb[181].mxu1  ;;  %v2895_v47 = vpack.c.bf16 %v3610_v48, %v3610_v48  ;;  %v1491_v32 = vpop.f32.mrb[182].mxu0 }
 0x247   :  { %v2020_v33 = vpop.f32.mrb[182].mxu1  ;;  %v3612_v13 = vpop.eup %3611  ;;  %v2095_v53 = vmax.f32 %v1566_v46, %v2017_v30  ;;  %v1567_v2 = vmax.f32 %v5149_v52, %v1491_v32  ;;  %v5161_v30 = vmax.f32 %v5159_v38, %v5160_v39 }
 0x248   :  { %v3311_v7 = vpop.f32.mrb[183].mxu0  ;;  %v3415_v50 = vpop.f32.mrb[183].mxu1  ;;  %2443 = vst.msk [vmem:[%s4968_s3 + $0x90] sm:$0xf] %vm2406_vm4, %v2895_v47  ;;  %v2896_v51 = vpack.c.bf16 %v3612_v13, %v3612_v13  ;;  %v5162_v13 = vld [vmem:[#allocation46_spill] sm:$0xff] }
 0x249   :  { %v2151_v10 = vadd.f32 %v4573_v24, %v2095_v53  ;;  %v2096_v11 = vmax.f32 %v1567_v2, %v2020_v33  ;;  %v5163_v53 = vld [vmem:[#allocation47_spill] sm:$0xff] }
 0x24a   :  { %2444 = vst.msk [vmem:[%s4968_s3 + $0x94] sm:$0xf] %vm2406_vm4, %v2896_v51  ;;  %v5164_v54 = vmax.f32 %v5162_v13, %v5163_v53 }
 0x24b   :  { %3617 = vtanh.f32 %v2151_v10  ;;  %v2152_v61 = vadd.f32 %v4573_v24, %v2096_v11 }
 0x24c   :  { %v1496_v62 = vpop.f32.mrb[184].mxu0  ;;  %v2025_v21 = vpop.f32.mrb[184].mxu1 }
 0x24d   :  { %v3614_v17 = vpop.eup %3613  ;;  %3619 = vtanh.f32 %v2152_v61  ;;  %v1568_v35 = vmax.f32 %v5152_v34, %v1496_v62  ;;  %v3314_v40 = vpop.f32.mrb[185].mxu0  ;;  %v5165_v61 = vld [vmem:[#allocation48_spill] sm:$0xff]  ;;  %v5166_v62 = vld [vmem:[#allocation49_spill] sm:$0xff] }
 0x24e   :  { %v3418_v44 = vpop.f32.mrb[185].mxu1  ;;  %v2897_v1 = vpack.c.bf16 %v3614_v17, %v3614_v17  ;;  %v1499_v56 = vpop.f32.mrb[186].mxu0 }
 0x24f   :  { %v2028_v57 = vpop.f32.mrb[186].mxu1  ;;  %v3616_v25 = vpop.eup %3615  ;;  %v2097_v26 = vmax.f32 %v1568_v35, %v2025_v21  ;;  %v1569_v42 = vmax.f32 %v5155_v28, %v1499_v56  ;;  %v5167_v21 = vmax.f32 %v5165_v61, %v5166_v62  ;;  %v3635_v44 = vld [vmem:[%s4967_s2] ss:$0 sm:$0xff] }
 0x250   :  { %v3315_v58 = vpop.f32.mrb[187].mxu0  ;;  %v3419_v59 = vpop.f32.mrb[187].mxu1  ;;  %2445 = vst.msk [vmem:[%s4968_s3 + $0x98] sm:$0xf] %vm2406_vm4, %v2897_v1  ;;  %v2898_v63 = vpack.c.bf16 %v3616_v25, %v3616_v25 }
 0x251   :  { %v2153_v8 = vadd.f32 %v4573_v24, %v2097_v26  ;;  %v2098_v9 = vmax.f32 %v1569_v42, %v2028_v57  ;;  %v5168_v26 = vld [vmem:[#allocation50_spill] sm:$0xff] }
 0x252   :  { %2446 = vst.msk [vmem:[%s4968_s3 + $0x9c] sm:$0xf] %vm2406_vm4, %v2898_v63  ;;  %v5170_v45 = vmax.f32 %v5168_v26, %v5169_v41 }
 0x253   :  { %3621 = vtanh.f32 %v2153_v8  ;;  %v2154_v36 = vadd.f32 %v4573_v24, %v2098_v9 }
 0x254   :  { %v1504_v37 = vpop.f32.mrb[188].mxu0  ;;  %v2033_v43 = vpop.f32.mrb[188].mxu1 }
 0x255   :  { %v3618_v5 = vpop.eup %3617  ;;  %3623 = vtanh.f32 %v2154_v36  ;;  %v1570_v31 = vmax.f32 %v5158_v23, %v1504_v37  ;;  %v3318_v4 = vpop.f32.mrb[189].mxu0 }
 0x256   :  { %v3422_v49 = vpop.f32.mrb[189].mxu1  ;;  %v2899_v15 = vpack.c.bf16 %v3618_v5, %v3618_v5  ;;  %v1507_v14 = vpop.f32.mrb[190].mxu0 }
 0x257   :  { %v2036_v60 = vpop.f32.mrb[190].mxu1  ;;  %v3620_v27 = vpop.eup %3619  ;;  %v2099_v29 = vmax.f32 %v1570_v31, %v2033_v43  ;;  %v1571_v48 = vmax.f32 %v5161_v30, %v1507_v14 }
 0x258   :  { %v3319_v19 = vpop.f32.mrb[191].mxu0  ;;  %v3423_v0 = vpop.f32.mrb[191].mxu1  ;;  %2447 = vst.msk [vmem:[%s4968_s3 + $0xa0] sm:$0xf] %vm2406_vm4, %v2899_v15  ;;  %v2900_v3 = vpack.c.bf16 %v3620_v27, %v3620_v27 }
 0x259   :  { %v2155_v46 = vadd.f32 %v4573_v24, %v2099_v29  ;;  %v2100_v16 = vmax.f32 %v1571_v48, %v2036_v60 }
 0x25a   :  { %2448 = vst.msk [vmem:[%s4968_s3 + $0xa4] sm:$0xf] %vm2406_vm4, %v2900_v3 }
 0x25b   :  { %3625 = vtanh.f32 %v2155_v46  ;;  %v2156_v20 = vadd.f32 %v4573_v24, %v2100_v16 }
 0x25c   :  { %v1512_v47 = vpop.f32.mrb[192].mxu0  ;;  %v2041_v32 = vpop.f32.mrb[192].mxu1 }
 0x25d   :  { %v3622_v33 = vpop.eup %3621  ;;  %3627 = vtanh.f32 %v2156_v20  ;;  %v1572_v55 = vmax.f32 %v5164_v54, %v1512_v47  ;;  %v3322_v52 = vpop.f32.mrb[193].mxu0 }
 0x25e   :  { %v3426_v2 = vpop.f32.mrb[193].mxu1  ;;  %v2901_v7 = vpack.c.bf16 %v3622_v33, %v3622_v33  ;;  %v1515_v50 = vpop.f32.mrb[194].mxu0 }
 0x25f   :  { %v2044_v51 = vpop.f32.mrb[194].mxu1  ;;  %v3624_v10 = vpop.eup %3623  ;;  %v2101_v11 = vmax.f32 %v1572_v55, %v2041_v32  ;;  %v1573_v17 = vmax.f32 %v5167_v21, %v1515_v50 }
 0x260   :  { %v3323_v12 = vpop.f32.mrb[195].mxu0  ;;  %v3427_v18 = vpop.f32.mrb[195].mxu1  ;;  %2449 = vst.msk [vmem:[%s4968_s3 + $0xa8] sm:$0xf] %vm2406_vm4, %v2901_v7  ;;  %v2902_v34 = vpack.c.bf16 %v3624_v10, %v3624_v10 }
 0x261   :  { %v2157_v35 = vadd.f32 %v4573_v24, %v2101_v11  ;;  %v2102_v40 = vmax.f32 %v1573_v17, %v2044_v51 }
 0x262   :  { %2450 = vst.msk [vmem:[%s4968_s3 + $0xac] sm:$0xf] %vm2406_vm4, %v2902_v34 }
 0x263   :  { %3629 = vtanh.f32 %v2157_v35  ;;  %v2158_v1 = vadd.f32 %v3635_v44, %v2102_v40 }
 0x264   :  { %v1520_v56 = vpop.f32.mrb[196].mxu0  ;;  %v2049_v57 = vpop.f32.mrb[196].mxu1 }
 0x265   :  { %v3626_v25 = vpop.eup %3625  ;;  %3631 = vtanh.f32 %v2158_v1  ;;  %v1574_v24 = vmax.f32 %v5170_v45, %v1520_v56  ;;  %v3326_v28 = vpop.f32.mrb[197].mxu0 }
 0x266   :  { %v3430_v42 = vpop.f32.mrb[197].mxu1  ;;  %v2903_v58 = vpack.c.bf16 %v3626_v25, %v3626_v25  ;;  %v1523_v59 = vpop.f32.mrb[198].mxu0 }
 0x267   :  { %v2052_v63 = vpop.f32.mrb[198].mxu1  ;;  %v3628_v8 = vpop.eup %3627  ;;  %v2103_v9 = vmax.f32 %v1574_v24, %v2049_v57 }
 0x268   :  { %v3327_v36 = vpop.f32.mrb[199].mxu0  ;;  %v3431_v37 = vpop.f32.mrb[199].mxu1  ;;  %2451 = vst.msk [vmem:[%s4968_s3 + $0xb0] sm:$0xf] %vm2406_vm4, %v2903_v58  ;;  %v2904_v43 = vpack.c.bf16 %v3628_v8, %v3628_v8 }
 0x269   :  { %v2159_v5 = vadd.f32 %v3635_v44, %v2103_v9 }
 0x26a   :  { %2452 = vst.msk [vmem:[%s4968_s3 + $0xb4] sm:$0xf] %vm2406_vm4, %v2904_v43 }
 0x26b   :  { %3633 = vtanh.f32 %v2159_v5 }
 0x26d   :  { %v3630_v6 = vpop.eup %3629 }
 0x26e   :  { %v2905_v22 = vpack.c.bf16 %v3630_v6, %v3630_v6 }
 0x26f   :  { %v3632_v23 = vpop.eup %3631 }
 0x270   :  { %2453 = vst.msk [vmem:[%s4968_s3 + $0xb8] sm:$0xf] %vm2406_vm4, %v2905_v22  ;;  %v2906_v31 = vpack.c.bf16 %v3632_v23, %v3632_v23 }
 0x272   :  { %2454 = vst.msk [vmem:[%s4968_s3 + $0xbc] sm:$0xf] %vm2406_vm4, %v2906_v31 }
 0x275   :  { %v3634_v4 = vpop.eup %3633 }
 0x276   :  { %v2907_v49 = vpack.c.bf16 %v3634_v4, %v3634_v4 }
 0x278   :  { %2455 = vst.msk [vmem:[%s4968_s3 + $0xc0] sm:$0xf] %vm2406_vm4, %v2907_v49 }

// kernel: lenet5_forward.4
= control target key start
LH: loop header
LB: loop body
LE: loop exit
PB: predicated region body
PF: predicated region fallthrough
CT: control target
= control target key end

     0   :  { %v810_v0 = vmov 0   ;;  %vm131_vm0 = vcmask 179200   ;;  %vm144_vm1 = vcmask 1042432   ;;  %vm634_vm2 = vcmask 125952   ;;  %s1109_s1 = inlined_call_operand.vmem [shape: bf16[150,16], index: 1, kind: input, shape index: {}]   ;;  %s1110_s0 = inlined_call_operand.vmem [shape: bf16[4,50,150], index: 0, kind: input, shape index: {}]   ;;  %s1111_s2 = inlined_call_operand.vmem [shape: f32[1,16], index: 2, kind: input, shape index: {}]   ;;  %s1112_s3 = inlined_call_operand.vmem [shape: bf16[50,16], index: 3, kind: output, shape index: {}]  }
   0x1   :  { %148 = vmatprep.subr.bf16.mxu0 %v810_v0  ;;  %265 = vmatprep.subr.bf16.mxu1 %v810_v0  ;;  %v836_v1 = vld [vmem:[%s1109_s1] sm:$0xff]   ;;  %v843_v2 = vld [vmem:[%s1109_s1 + $0x8] sm:$0xff]   ;;  %v852_v3 = vld [vmem:[%s1109_s1 + $0x10] sm:$0xff]   ;;  %vm641_vm3 = vcmask 122880  }
   0x2   :  { %149 = vmatpush1.bf16.msra.mxu0 %v836_v1  ;;  %266 = vmatpush1.bf16.msra.mxu1 %v836_v1  ;;  %v861_v4 = vld [vmem:[%s1109_s1 + $0x18] sm:$0xff]   ;;  %v754_v5 = vld [vmem:[%s1110_s0 + $0x4] ss:$8 sps:$4 sm:$0xff]   ;;  %v896_v9 = vld [vmem:[%s1109_s1 + $0x30] sm:$0xff]  }
   0x3   :  { %150 = vmatprep.subr.bf16.mxu0 %v810_v0  ;;  %267 = vmatprep.subr.bf16.mxu1 %v810_v0  ;;  %v757_v6 = vld [vmem:[%s1110_s0 + $0x3c] ss:$8 sps:$4 sm:$0xff]   ;;  %v887_v8 = vld [vmem:[%s1109_s1 + $0x28] sm:$0xff]   ;;  %v755_v15 = vld [vmem:[%s1110_s0 + $0x38] ss:$8 sps:$4 sm:$0xff]  }
   0x4   :  { %665 = vmatprep.mubr.msk.bf16.mxu0 %vm131_vm0, %v754_v5  ;;  %v877_v7 = vld [vmem:[%s1109_s1 + $0x20] sm:$0xff]   ;;  %684 = vmatprep.mubr.msk.bf16.mxu1 %vm131_vm0, %v757_v6  ;;  %v905_v10 = vld [vmem:[%s1109_s1 + $0x38] sm:$0xff]   ;;  %v751_v12 = vld [vmem:[%s1109_s1 + $0x48] ss:$0 sps:$4 sm:$0x77]  }
   0x5   :  { %v914_v11 = vld [vmem:[%s1109_s1 + $0x40] sm:$0xff]   ;;  %v925_v13 = vsel %vm144_vm1, %v751_v12, 0  ;;  %v758_v16 = vld [vmem:[%s1110_s0 + $0x14] ss:$8 sps:$4 sm:$0xff]   ;;  %v760_v18 = vld [vmem:[%s1110_s0 + $0x10] ss:$8 sps:$4 sm:$0xff]  }
   0x6   :  { %151 = vmatpush1.bf16.msra.mxu0 %v843_v2  ;;  %268 = vmatpush1.bf16.msra.mxu1 %v843_v2  ;;  %v752_v14 = vld [vmem:[%s1110_s0] ss:$8 sps:$4 sm:$0xff]   ;;  %v761_v17 = vld [vmem:[%s1110_s0 + $0x4c] ss:$8 sps:$4 sm:$0xff]   ;;  %v767_v21 = vld [vmem:[%s1110_s0 + $0x5c] ss:$8 sps:$4 sm:$0xff]  }
   0x7   :  { %152 = vmatprep.subr.bf16.mxu0 %v810_v0  ;;  %269 = vmatprep.subr.bf16.mxu1 %v810_v0  ;;  %v763_v19 = vld [vmem:[%s1110_s0 + $0x48] ss:$8 sps:$4 sm:$0xff]   ;;  %v764_v20 = vld [vmem:[%s1110_s0 + $0x24] ss:$8 sps:$4 sm:$0xff]   ;;  %v769_v23 = vld [vmem:[%s1110_s0 + $0x58] ss:$8 sps:$4 sm:$0xff]  }
   0x8   :  { %v766_v22 = vld [vmem:[%s1110_s0 + $0x20] ss:$8 sps:$4 sm:$0xff]   ;;  %v40_v24 = vld [vmem:[%s1110_s0 + $0x30] sm:$0x11]  ;;  %v780_v34 = vld [vmem:[%s1110_s0 + $0x84] ss:$8 sps:$4 sm:$0xff]  }
   0x9   :  { %v675_v25 = vld [vmem:[%s1110_s0 + $0x68] sm:$0x11]  ;;  %v654_v26 = vcombine.high %v40_v24, %v40_v24  ;;  %v653_v28 = vcombine.low %v40_v24, %v40_v24  ;;  %v776_v30 = vld [vmem:[%s1110_s0 + $0x74] ss:$8 sps:$4 sm:$0xff]   ;;  %v774_v32 = vld [vmem:[%s1110_s0 + $0x70] ss:$8 sps:$4 sm:$0xff]  }
   0xa   :  { %153 = vmatpush1.bf16.msra.mxu0 %v852_v3  ;;  %270 = vmatpush1.bf16.msra.mxu1 %v852_v3  ;;  %v683_v27 = vcombine.high %v675_v25, %v675_v25  ;;  %v682_v29 = vcombine.low %v675_v25, %v675_v25  ;;  %v779_v31 = vld [vmem:[%s1110_s0 + $0xac] ss:$8 sps:$4 sm:$0xff]   ;;  %v777_v33 = vld [vmem:[%s1110_s0 + $0xa8] ss:$8 sps:$4 sm:$0xff]   ;;  %v782_v35 = vld [vmem:[%s1110_s0 + $0xbc] ss:$8 sps:$4 sm:$0xff]  }
   0xb   :  { %154 = vmatprep.subr.bf16.mxu0 %v810_v0  ;;  %271 = vmatprep.subr.bf16.mxu1 %v810_v0  ;;  %v784_v36 = vld [vmem:[%s1110_s0 + $0x80] ss:$8 sps:$4 sm:$0xff]   ;;  %v786_v38 = vld [vmem:[%s1110_s0 + $0x94] ss:$8 sps:$4 sm:$0xff]   ;;  %v790_v42 = vld [vmem:[%s1110_s0 + $0x90] ss:$8 sps:$4 sm:$0xff]  }
   0xc   :  { %v785_v37 = vld [vmem:[%s1110_s0 + $0xb8] ss:$8 sps:$4 sm:$0xff]   ;;  %v788_v39 = vld [vmem:[%s1110_s0 + $0xcc] ss:$8 sps:$4 sm:$0xff]   ;;  %v791_v43 = vld [vmem:[%s1110_s0 + $0xc8] ss:$8 sps:$4 sm:$0xff]  }
   0xd   :  { %v694_v40 = vld [vmem:[%s1110_s0 + $0xa0] sm:$0x11]  ;;  %v713_v41 = vld [vmem:[%s1110_s0 + $0xd8] sm:$0x11] }
   0xe   :  { %155 = vmatpush1.bf16.msra.mxu0 %v861_v4  ;;  %272 = vmatpush1.bf16.msra.mxu1 %v861_v4  ;;  %v702_v44 = vcombine.high %v694_v40, %v694_v40  ;;  %v721_v45 = vcombine.high %v713_v41, %v713_v41  ;;  %v701_v46 = vcombine.low %v694_v40, %v694_v40 }
   0xf   :  { %156 = vmatprep.subr.bf16.mxu0 %v810_v0  ;;  %273 = vmatprep.subr.bf16.mxu1 %v810_v0  ;;  %v720_v47 = vcombine.low %v713_v41, %v713_v41 }
  0x12   :  { %157 = vmatpush1.bf16.msra.mxu0 %v877_v7  ;;  %274 = vmatpush1.bf16.msra.mxu1 %v877_v7 }
  0x13   :  { %158 = vmatprep.subr.bf16.mxu0 %v810_v0  ;;  %275 = vmatprep.subr.bf16.mxu1 %v810_v0 }
  0x16   :  { %159 = vmatpush1.bf16.msra.mxu0 %v887_v8  ;;  %276 = vmatpush1.bf16.msra.mxu1 %v887_v8 }
  0x17   :  { %160 = vmatprep.subr.bf16.mxu0 %v810_v0  ;;  %277 = vmatprep.subr.bf16.mxu1 %v810_v0 }
  0x1a   :  { %161 = vmatpush1.bf16.msra.mxu0 %v896_v9  ;;  %278 = vmatpush1.bf16.msra.mxu1 %v896_v9 }
  0x1b   :  { %162 = vmatprep.subr.bf16.mxu0 %v810_v0  ;;  %279 = vmatprep.subr.bf16.mxu1 %v810_v0 }
  0x1e   :  { %163 = vmatpush1.bf16.msra.mxu0 %v905_v10  ;;  %280 = vmatpush1.bf16.msra.mxu1 %v905_v10 }
  0x1f   :  { %164 = vmatprep.subr.bf16.mxu0 %v810_v0  ;;  %281 = vmatprep.subr.bf16.mxu1 %v810_v0 }
  0x22   :  { %165 = vmatpush1.bf16.msra.mxu0 %v914_v11  ;;  %282 = vmatpush1.bf16.msra.mxu1 %v914_v11 }
  0x23   :  { %166 = vmatprep.subr.bf16.mxu0 %v810_v0  ;;  %283 = vmatprep.subr.bf16.mxu1 %v810_v0 }
  0x26   :  { %167 = vmatpush1.bf16.msra.mxu0 %v925_v13  ;;  %284 = vmatpush1.bf16.msra.mxu1 %v925_v13 }
  0x27   :  { %389 = vmatprep.subr.bf16.mxu0 %v810_v0  ;;  %513 = vmatprep.subr.bf16.mxu1 %v810_v0 }
  0x29   :  { %181 = vmatmul.mubr.bf16.vlgmr.msra.gmra.mrb[0].mxu0 %v752_v14  ;;  %298 = vmatmul.mubr.bf16.vlgmr.msra.gmra.mrb[0].mxu1 %v755_v15 }
  0x2a   :  { %390 = vmatpush1.bf16.msra.mxu0 %v836_v1  ;;  %514 = vmatpush1.bf16.msra.mxu1 %v836_v1 }
  0x2b   :  { %391 = vmatprep.subr.bf16.mxu0 %v810_v0  ;;  %515 = vmatprep.subr.bf16.mxu1 %v810_v0 }
  0x2c   :  { %666 = vmatprep.mubr.msk.bf16.mxu0 %vm131_vm0, %v758_v16  ;;  %685 = vmatprep.mubr.msk.bf16.mxu1 %vm131_vm0, %v761_v17 }
  0x2e   :  { %392 = vmatpush1.bf16.msra.mxu0 %v843_v2  ;;  %516 = vmatpush1.bf16.msra.mxu1 %v843_v2 }
  0x2f   :  { %393 = vmatprep.subr.bf16.mxu0 %v810_v0  ;;  %517 = vmatprep.subr.bf16.mxu1 %v810_v0 }
  0x31   :  { %189 = vmatmul.mubr.bf16.gmra.mrb[4].mxu0 %v760_v18  ;;  %306 = vmatmul.mubr.bf16.gmra.mrb[4].mxu1 %v763_v19 }
  0x32   :  { %394 = vmatpush1.bf16.msra.mxu0 %v852_v3  ;;  %518 = vmatpush1.bf16.msra.mxu1 %v852_v3 }
  0x33   :  { %395 = vmatprep.subr.bf16.mxu0 %v810_v0  ;;  %519 = vmatprep.subr.bf16.mxu1 %v810_v0 }
  0x34   :  { %667 = vmatprep.mubr.msk.bf16.mxu0 %vm131_vm0, %v764_v20  ;;  %686 = vmatprep.mubr.msk.bf16.mxu1 %vm131_vm0, %v767_v21 }
  0x36   :  { %396 = vmatpush1.bf16.msra.mxu0 %v861_v4  ;;  %520 = vmatpush1.bf16.msra.mxu1 %v861_v4 }
  0x37   :  { %397 = vmatprep.subr.bf16.mxu0 %v810_v0  ;;  %521 = vmatprep.subr.bf16.mxu1 %v810_v0 }
  0x39   :  { %197 = vmatmul.mubr.bf16.gmra.mrb[8].mxu0 %v766_v22  ;;  %314 = vmatmul.mubr.bf16.gmra.mrb[8].mxu1 %v769_v23 }
  0x3a   :  { %398 = vmatpush1.bf16.msra.mxu0 %v877_v7  ;;  %522 = vmatpush1.bf16.msra.mxu1 %v877_v7 }
  0x3b   :  { %399 = vmatprep.subr.bf16.mxu0 %v810_v0  ;;  %523 = vmatprep.subr.bf16.mxu1 %v810_v0 }
  0x3c   :  { %668 = vmatprep.mubr.msk.bf16.mxu0 %vm131_vm0, %v654_v26  ;;  %687 = vmatprep.mubr.msk.bf16.mxu1 %vm131_vm0, %v683_v27 }
  0x3e   :  { %400 = vmatpush1.bf16.msra.mxu0 %v887_v8  ;;  %524 = vmatpush1.bf16.msra.mxu1 %v887_v8 }
  0x3f   :  { %401 = vmatprep.subr.bf16.mxu0 %v810_v0  ;;  %525 = vmatprep.subr.bf16.mxu1 %v810_v0 }
  0x41   :  { %205 = vmatmul.mubr.bf16.gmra.mrb[12].mxu0 %v653_v28  ;;  %322 = vmatmul.mubr.bf16.gmra.mrb[12].mxu1 %v682_v29  ;;  %v1070_v28 = vld [vmem:[%s1111_s2] ss:$0 sm:$0xff] }
  0x42   :  { %402 = vmatpush1.bf16.msra.mxu0 %v896_v9  ;;  %526 = vmatpush1.bf16.msra.mxu1 %v896_v9 }
  0x43   :  { %403 = vmatprep.subr.bf16.mxu0 %v810_v0  ;;  %527 = vmatprep.subr.bf16.mxu1 %v810_v0 }
  0x44   :  { %703 = vmatprep.mubr.msk.bf16.mxu0 %vm131_vm0, %v776_v30  ;;  %722 = vmatprep.mubr.msk.bf16.mxu1 %vm131_vm0, %v779_v31 }
  0x46   :  { %404 = vmatpush1.bf16.msra.mxu0 %v905_v10  ;;  %528 = vmatpush1.bf16.msra.mxu1 %v905_v10 }
  0x47   :  { %405 = vmatprep.subr.bf16.mxu0 %v810_v0  ;;  %529 = vmatprep.subr.bf16.mxu1 %v810_v0 }
  0x4a   :  { %406 = vmatpush1.bf16.msra.mxu0 %v914_v11  ;;  %530 = vmatpush1.bf16.msra.mxu1 %v914_v11 }
  0x4b   :  { %407 = vmatprep.subr.bf16.mxu0 %v810_v0  ;;  %531 = vmatprep.subr.bf16.mxu1 %v810_v0 }
  0x4e   :  { %408 = vmatpush1.bf16.msra.mxu0 %v925_v13  ;;  %532 = vmatpush1.bf16.msra.mxu1 %v925_v13 }
  0x51   :  { %422 = vmatmul.mubr.bf16.vlgmr.msra.gmra.mrb[16].mxu0 %v774_v32  ;;  %546 = vmatmul.mubr.bf16.vlgmr.msra.gmra.mrb[16].mxu1 %v777_v33 }
  0x52   :  { %704 = vmatprep.mubr.msk.bf16.mxu0 %vm131_vm0, %v780_v34  ;;  %723 = vmatprep.mubr.msk.bf16.mxu1 %vm131_vm0, %v782_v35 }
  0x59   :  { %430 = vmatmul.mubr.bf16.gmra.mrb[20].mxu0 %v784_v36  ;;  %554 = vmatmul.mubr.bf16.gmra.mrb[20].mxu1 %v785_v37 }
  0x5a   :  { %705 = vmatprep.mubr.msk.bf16.mxu0 %vm131_vm0, %v786_v38  ;;  %724 = vmatprep.mubr.msk.bf16.mxu1 %vm131_vm0, %v788_v39 }
  0x61   :  { %438 = vmatmul.mubr.bf16.gmra.mrb[24].mxu0 %v790_v42  ;;  %562 = vmatmul.mubr.bf16.gmra.mrb[24].mxu1 %v791_v43 }
  0x62   :  { %706 = vmatprep.mubr.msk.bf16.mxu0 %vm131_vm0, %v702_v44  ;;  %725 = vmatprep.mubr.msk.bf16.mxu1 %vm131_vm0, %v721_v45 }
  0x69   :  { %446 = vmatmul.mubr.bf16.gmra.mrb[28].mxu0 %v701_v46  ;;  %570 = vmatmul.mubr.bf16.gmra.mrb[28].mxu1 %v720_v47 }
  0xfc   :  { %v182_v48 = vpop.f32.mrb[0].mxu0  ;;  %v299_v49 = vpop.f32.mrb[0].mxu1 }
  0xfd   :  { %v329_v50 = vmax.f32 %v182_v48, %v299_v49  ;;  %v184_v51 = vpop.f32.mrb[1].mxu0  ;;  %v301_v52 = vpop.f32.mrb[1].mxu1 }
  0xfe   :  { %v185_v53 = vpop.f32.mrb[2].mxu0  ;;  %v302_v54 = vpop.f32.mrb[2].mxu1 }
  0xff   :  { %v330_v55 = vmax.f32 %v185_v53, %v302_v54  ;;  %v187_v56 = vpop.f32.mrb[3].mxu0  ;;  %v304_v57 = vpop.f32.mrb[3].mxu1 }
 0x104   :  { %v190_v58 = vpop.f32.mrb[4].mxu0  ;;  %v307_v59 = vpop.f32.mrb[4].mxu1 }
 0x105   :  { %v192_v60 = vpop.f32.mrb[5].mxu0  ;;  %v331_v61 = vmax.f32 %v190_v58, %v307_v59  ;;  %v309_v62 = vpop.f32.mrb[5].mxu1 }
 0x106   :  { %v193_v63 = vpop.f32.mrb[6].mxu0  ;;  %v310_v0 = vpop.f32.mrb[6].mxu1 }
 0x107   :  { %v195_v1 = vpop.f32.mrb[7].mxu0  ;;  %v332_v2 = vmax.f32 %v193_v63, %v310_v0  ;;  %v312_v3 = vpop.f32.mrb[7].mxu1 }
 0x10c   :  { %v198_v4 = vpop.f32.mrb[8].mxu0  ;;  %v315_v5 = vpop.f32.mrb[8].mxu1 }
 0x10d   :  { %v200_v6 = vpop.f32.mrb[9].mxu0  ;;  %v333_v7 = vmax.f32 %v198_v4, %v315_v5  ;;  %v317_v8 = vpop.f32.mrb[9].mxu1 }
 0x10e   :  { %v201_v9 = vpop.f32.mrb[10].mxu0  ;;  %v318_v10 = vpop.f32.mrb[10].mxu1 }
 0x10f   :  { %v203_v11 = vpop.f32.mrb[11].mxu0  ;;  %v334_v12 = vmax.f32 %v201_v9, %v318_v10  ;;  %v320_v13 = vpop.f32.mrb[11].mxu1 }
 0x114   :  { %v1061_v14 = vpop.f32.mrb[12].mxu0  ;;  %v1063_v15 = vpop.f32.mrb[12].mxu1 }
 0x115   :  { %v208_v16 = vpop.f32.mrb[13].mxu0  ;;  %v335_v17 = vmax.f32 %v1061_v14, %v1063_v15  ;;  %v325_v18 = vpop.f32.mrb[13].mxu1 }
 0x116   :  { %v209_v19 = vpop.f32.mrb[14].mxu0  ;;  %v326_v20 = vpop.f32.mrb[14].mxu1 }
 0x117   :  { %v210_v21 = vpop.f32.mrb[15].mxu0  ;;  %v327_v22 = vpop.f32.mrb[15].mxu1 }
 0x124   :  { %v423_v23 = vpop.f32.mrb[16].mxu0  ;;  %v547_v24 = vpop.f32.mrb[16].mxu1 }
 0x125   :  { %v453_v25 = vmax.f32 %v329_v50, %v423_v23  ;;  %v425_v26 = vpop.f32.mrb[17].mxu0  ;;  %v549_v27 = vpop.f32.mrb[17].mxu1 }
 0x126   :  { %v426_v29 = vpop.f32.mrb[18].mxu0  ;;  %v550_v30 = vpop.f32.mrb[18].mxu1 }
 0x127   :  { %v577_v31 = vmax.f32 %v453_v25, %v547_v24  ;;  %v454_v32 = vmax.f32 %v330_v55, %v426_v29  ;;  %v428_v33 = vpop.f32.mrb[19].mxu0  ;;  %v552_v34 = vpop.f32.mrb[19].mxu1 }
 0x129   :  { %v591_v35 = vadd.f32 %v1070_v28, %v577_v31  ;;  %v578_v36 = vmax.f32 %v454_v32, %v550_v30 }
 0x12b   :  { %796 = vtanh.f32 %v591_v35  ;;  %v592_v37 = vadd.f32 %v1070_v28, %v578_v36 }
 0x12c   :  { %v431_v38 = vpop.f32.mrb[20].mxu0  ;;  %v555_v39 = vpop.f32.mrb[20].mxu1 }
 0x12d   :  { %798 = vtanh.f32 %v592_v37  ;;  %v455_v40 = vmax.f32 %v331_v61, %v431_v38  ;;  %v433_v41 = vpop.f32.mrb[21].mxu0  ;;  %v557_v42 = vpop.f32.mrb[21].mxu1 }
 0x12e   :  { %v434_v43 = vpop.f32.mrb[22].mxu0  ;;  %v558_v44 = vpop.f32.mrb[22].mxu1 }
 0x12f   :  { %v579_v45 = vmax.f32 %v455_v40, %v555_v39  ;;  %v456_v46 = vmax.f32 %v332_v2, %v434_v43  ;;  %v436_v47 = vpop.f32.mrb[23].mxu0  ;;  %v560_v48 = vpop.f32.mrb[23].mxu1 }
 0x131   :  { %v593_v49 = vadd.f32 %v1070_v28, %v579_v45  ;;  %v580_v50 = vmax.f32 %v456_v46, %v558_v44 }
 0x133   :  { %800 = vtanh.f32 %v593_v49  ;;  %v594_v51 = vadd.f32 %v1070_v28, %v580_v50 }
 0x134   :  { %v439_v52 = vpop.f32.mrb[24].mxu0  ;;  %v563_v53 = vpop.f32.mrb[24].mxu1 }
 0x135   :  { %v797_v54 = vpop.eup %796  ;;  %802 = vtanh.f32 %v594_v51  ;;  %v457_v55 = vmax.f32 %v333_v7, %v439_v52  ;;  %v441_v56 = vpop.f32.mrb[25].mxu0 }
 0x136   :  { %v565_v57 = vpop.f32.mrb[25].mxu1  ;;  %v734_v58 = vpack.c.bf16 %v797_v54, %v797_v54  ;;  %v442_v59 = vpop.f32.mrb[26].mxu0 }
 0x137   :  { %v566_v60 = vpop.f32.mrb[26].mxu1  ;;  %v799_v61 = vpop.eup %798  ;;  %v581_v62 = vmax.f32 %v457_v55, %v563_v53  ;;  %v458_v63 = vmax.f32 %v334_v12, %v442_v59 }
 0x138   :  { %v444_v0 = vpop.f32.mrb[27].mxu0  ;;  %v568_v1 = vpop.f32.mrb[27].mxu1  ;;  %635 = vst.msk [vmem:[%s1112_s3] sm:$0xf] %vm634_vm2, %v734_v58  ;;  %v735_v2 = vpack.c.bf16 %v799_v61, %v799_v61 }
 0x139   :  { %v595_v3 = vadd.f32 %v1070_v28, %v581_v62  ;;  %v582_v4 = vmax.f32 %v458_v63, %v566_v60 }
 0x13a   :  { %636 = vst.msk [vmem:[%s1112_s3 + $0x4] sm:$0xf] %vm634_vm2, %v735_v2 }
 0x13b   :  { %804 = vtanh.f32 %v595_v3  ;;  %v596_v5 = vadd.f32 %v1070_v28, %v582_v4 }
 0x13c   :  { %v447_v6 = vpop.f32.mrb[28].mxu0  ;;  %v571_v7 = vpop.f32.mrb[28].mxu1 }
 0x13d   :  { %v801_v8 = vpop.eup %800  ;;  %806 = vtanh.f32 %v596_v5  ;;  %v459_v9 = vmax.f32 %v335_v17, %v447_v6  ;;  %v449_v10 = vpop.f32.mrb[29].mxu0 }
 0x13e   :  { %v573_v11 = vpop.f32.mrb[29].mxu1  ;;  %v736_v12 = vpack.c.bf16 %v801_v8, %v801_v8  ;;  %v450_v13 = vpop.f32.mrb[30].mxu0 }
 0x13f   :  { %v574_v16 = vpop.f32.mrb[30].mxu1  ;;  %v803_v18 = vpop.eup %802  ;;  %v583_v19 = vmax.f32 %v459_v9, %v571_v7 }
 0x140   :  { %v451_v20 = vpop.f32.mrb[31].mxu0  ;;  %v575_v21 = vpop.f32.mrb[31].mxu1  ;;  %637 = vst.msk [vmem:[%s1112_s3 + $0x8] sm:$0xf] %vm634_vm2, %v736_v12  ;;  %v737_v22 = vpack.c.bf16 %v803_v18, %v803_v18 }
 0x141   :  { %v597_v23 = vadd.f32 %v1070_v28, %v583_v19 }
 0x142   :  { %638 = vst.msk [vmem:[%s1112_s3 + $0xc] sm:$0xf] %vm634_vm2, %v737_v22 }
 0x143   :  { %808 = vtanh.f32 %v597_v23 }
 0x145   :  { %v805_v14 = vpop.eup %804 }
 0x146   :  { %v738_v15 = vpack.c.bf16 %v805_v14, %v805_v14 }
 0x147   :  { %v807_v17 = vpop.eup %806 }
 0x148   :  { %639 = vst.msk [vmem:[%s1112_s3 + $0x10] sm:$0xf] %vm634_vm2, %v738_v15  ;;  %v739_v24 = vpack.c.bf16 %v807_v17, %v807_v17 }
 0x14a   :  { %640 = vst.msk [vmem:[%s1112_s3 + $0x14] sm:$0xf] %vm634_vm2, %v739_v24 }
 0x14d   :  { %v809_v25 = vpop.eup %808 }
 0x14e   :  { %v740_v26 = vpack.c.bf16 %v809_v25, %v809_v25 }
 0x150   :  { %642 = vst.msk [vmem:[%s1112_s3 + $0x18] sm:$0x1] %vm641_vm3, %v740_v26 }

// kernel: lenet5_forward.5
= control target key start
LH: loop header
LB: loop body
LE: loop exit
PB: predicated region body
PF: predicated region fallthrough
CT: control target
= control target key end

     0   :  { %v774_v1 = vmov 0   ;;  %v98_v20 = vlaneseq  ;;  %v775_v25 = vmov 1966171168   ;;  %vm264_vm0 = vcmask 130048   ;;  %s986_s0 = inlined_call_operand.vmem [shape: bf16[2,400], index: 0, kind: input, shape index: {}]   ;;  %s987_s1 = inlined_call_operand.vmem [shape: bf16[400,120], index: 1, kind: input, shape index: {}]   ;;  %s988_s2 = inlined_call_operand.vmem [shape: f32[1,120], index: 2, kind: input, shape index: {}]   ;;  %s989_s3 = inlined_call_operand.vmem [shape: bf16[120,84], index: 3, kind: input, shape index: {}]   ;;  %s990_s4 = inlined_call_operand.vmem [shape: f32[1,84], index: 4, kind: input, shape index: {}]   ;;  %s991_s5 = inlined_call_operand.vmem [shape: bf16[84,10], index: 5, kind: input, shape index: {}]   ;;  %s992_s6 = inlined_call_operand.vmem [shape: f32[1,10], index: 6, kind: input, shape index: {}]   ;;  %s993_s7 = inlined_call_operand.hbm [shape: f32[2,10], index: 7, kind: output, shape index: {}]  }
   0x1   :  { %v707_v0 = vld [vmem:[%s987_s1 + $0x40] sm:$0xff]   ;;  %308 = vmatprep.subr.bf16.mxu1 %v774_v1  ;;  %v710_v4 = vld [vmem:[%s987_s1 + $0x48] sm:$0xff]   ;;  %v713_v7 = vld [vmem:[%s987_s1 + $0x50] sm:$0xff]   ;;  %v96_v26 = vunpack.c.l.s4 %v775_v25  ;;  %v776_v38 = vmov 0.0  }
   0x2   :  { %v708_v2 = vld [vmem:[%s987_s1 + $0x80] sm:$0xff]   ;;  %628 = vmatprep.subr.bf16.mxu0 %v707_v0  ;;  %v711_v5 = vld [vmem:[%s987_s1 + $0x88] sm:$0xff]   ;;  %v714_v8 = vld [vmem:[%s987_s1 + $0x90] sm:$0xff]   ;;  %v99_v27 = vshrl.u32 %v98_v20, 7 }
   0x3   :  { %v709_v3 = vld [vmem:[%s987_s1] sm:$0xff]   ;;  %309 = vmatpush1.bf16.msra.mxu1 %v708_v2  ;;  %v712_v6 = vld [vmem:[%s987_s1 + $0x8] sm:$0xff]   ;;  %v715_v9 = vld [vmem:[%s987_s1 + $0x10] sm:$0xff]   ;;  %v97_v30 = vunpack.c.0.s8 %v96_v26 }
   0x4   :  { %629 = vmatpush3.bf16.msra.mxu0 %v709_v3  ;;  %310 = vmatprep.subr.bf16.mxu1 %v774_v1  ;;  %v716_v10 = vld [vmem:[%s987_s1 + $0x58] sm:$0xff]   ;;  %v719_v13 = vld [vmem:[%s987_s1 + $0x60] sm:$0xff]   ;;  %v722_v16 = vld [vmem:[%s987_s1 + $0x68] sm:$0xff]  }
   0x5   :  { %630 = vmatprep.subr.bf16.mxu0 %v710_v4  ;;  %v717_v11 = vld [vmem:[%s987_s1 + $0x98] sm:$0xff]   ;;  %v720_v14 = vld [vmem:[%s987_s1 + $0xa0] sm:$0xff]   ;;  %v723_v17 = vld [vmem:[%s987_s1 + $0xa8] sm:$0xff]   ;;  %v100_v32 = vsub.s32 %v97_v30, %v99_v27 }
   0x6   :  { %v718_v12 = vld [vmem:[%s987_s1 + $0x18] sm:$0xff]   ;;  %v721_v15 = vld [vmem:[%s987_s1 + $0x20] sm:$0xff]   ;;  %v724_v18 = vld [vmem:[%s987_s1 + $0x28] sm:$0xff]  }
   0x7   :  { %311 = vmatpush1.bf16.msra.mxu1 %v711_v5  ;;  %v725_v19 = vld [vmem:[%s987_s1 + $0x70] sm:$0xff]   ;;  %v583_v23 = vld.sshfl [vmem:[%s986_s0] sm:$0x33 pattern:$0x75316420]  ;;  %v728_v24 = vld [vmem:[%s987_s1 + $0x78] sm:$0xff]  }
   0x8   :  { %631 = vmatpush3.bf16.msra.mxu0 %v712_v6  ;;  %312 = vmatprep.subr.bf16.mxu1 %v774_v1  ;;  %v726_v21 = vld [vmem:[%s987_s1 + $0xb0] sm:$0xff]   ;;  %v729_v28 = vld [vmem:[%s987_s1 + $0xb8] sm:$0xff]   ;;  %v94_v29 = vcombine.high %v583_v23, %v583_v23  ;;  %v731_v33 = vld [vmem:[%s987_s1 + $0xc0] sm:$0xff]   ;;  %v101_v36 = vrot.slane %v583_v23, %v100_v32 }
   0x9   :  { %632 = vmatprep.subr.bf16.mxu0 %v713_v7  ;;  %v727_v22 = vld [vmem:[%s987_s1 + $0x30] sm:$0xff]   ;;  %v730_v31 = vld [vmem:[%s987_s1 + $0x38] sm:$0xff]   ;;  %v732_v34 = vld [vmem:[%s989_s3] sm:$0xff]  }
   0xa   :  { %v108_v35 = vrot.slane %v94_v29, %v100_v32  ;;  %v109_v39 = vcombine.high %v101_v36, %v101_v36 }
   0xb   :  { %313 = vmatpush1.bf16.msra.mxu1 %v714_v8 }
   0xc   :  { %633 = vmatpush3.bf16.msra.mxu0 %v715_v9  ;;  %314 = vmatprep.subr.bf16.mxu1 %v774_v1  ;;  %v110_v37 = vcombine.high %v108_v35, %v108_v35 }
   0xd   :  { %634 = vmatprep.subr.bf16.mxu0 %v716_v10  ;;  %300 = vmatprep.mubr.bf16.mxu0 %v108_v35 }
   0xf   :  { %315 = vmatpush1.bf16.msra.mxu1 %v717_v11 }
  0x10   :  { %635 = vmatpush3.bf16.msra.mxu0 %v718_v12  ;;  %316 = vmatprep.subr.bf16.mxu1 %v774_v1 }
  0x11   :  { %636 = vmatprep.subr.bf16.mxu0 %v719_v13 }
  0x13   :  { %317 = vmatpush1.bf16.msra.mxu1 %v720_v14 }
  0x14   :  { %637 = vmatpush3.bf16.msra.mxu0 %v721_v15  ;;  %318 = vmatprep.subr.bf16.mxu1 %v774_v1 }
  0x15   :  { %638 = vmatprep.subr.bf16.mxu0 %v722_v16 }
  0x17   :  { %319 = vmatpush1.bf16.msra.mxu1 %v723_v17 }
  0x18   :  { %639 = vmatpush3.bf16.msra.mxu0 %v724_v18  ;;  %320 = vmatprep.subr.bf16.mxu1 %v774_v1 }
  0x19   :  { %640 = vmatprep.subr.bf16.mxu0 %v725_v19 }
  0x1b   :  { %321 = vmatpush1.bf16.msra.mxu1 %v726_v21 }
  0x1c   :  { %641 = vmatpush3.bf16.msra.mxu0 %v727_v22  ;;  %322 = vmatprep.subr.bf16.mxu1 %v774_v1 }
  0x1d   :  { %642 = vmatprep.subr.bf16.mxu0 %v728_v24 }
  0x1f   :  { %323 = vmatpush1.bf16.msra.mxu1 %v729_v28 }
  0x20   :  { %643 = vmatpush3.bf16.msra.mxu0 %v730_v31  ;;  %324 = vmatprep.subr.bf16.mxu1 %v774_v1 }
  0x21   :  { %666 = vmatprep.subr.bf16.mxu0 %v776_v38 }
  0x23   :  { %301 = vmatmul.mubr.bf16.vlgmr.msra.gmra.mrb[0].mxu0 %v101_v36  ;;  %325 = vmatpush1.bf16.msra.mxu1 %v731_v33 }
  0x24   :  { %12 = vsyncpa [#allocation3], 0  ;;  %609 = vmatprep.mubr.msk.bf16.mxu1 %vm264_vm0, %v110_v37  ;;  %667 = vmatpush3.bf16.msra.mxu0 %v732_v34  ;;  %v733_v40 = vld [vmem:[%s989_s3 + $0x8] sm:$0xff]   ;;  %v734_v41 = vld [vmem:[%s989_s3 + $0x10] sm:$0xff]   ;;  %vm421_vm1 = vcmask 1043456   ;;  %vm777_vm2 = vmmov 0  }
  0x25   :  { %668 = vmatprep.subr.bf16.mxu0 %v776_v38  ;;  %686 = vmatprep.subr.bf16.mxu1 %v776_v38  ;;  %v735_v42 = vld [vmem:[%s989_s3 + $0x18] sm:$0xff]   ;;  %v736_v43 = vld [vmem:[%s989_s3 + $0x20] sm:$0xff]   ;;  %v737_v44 = vld [vmem:[%s989_s3 + $0x28] sm:$0xff]   ;;  %vm417_vm3 = vcmask 982016   ;;  %vm522_vm4 = vcmask 1041408   ;;  %vm518_vm5 = vcmask 687104  }
  0x26   :  { %341 = vmatmul.mubr.bf16.vlgmr.msra.gmra.mrb[0].mxu1 %v109_v39  ;;  %v738_v45 = vld [vmem:[%s989_s3 + $0x30] sm:$0xff]   ;;  %v739_v46 = vld [vmem:[%s989_s3 + $0x38] ss:$0 sps:$4 sm:$0xff]   ;;  %682 = vmatprep.mubr.msk.bf16.mxu0 %vm777_vm2, %v776_v38  ;;  %v740_v48 = vld [vmem:[%s991_s5] sm:$0xff]   ;;  %vm566_vm6 = vcmask 74752  }
  0x27   :  { %v423_v47 = vsel %vm421_vm1, %v739_v46, 0  ;;  %698 = vmatprep.mubr.msk.bf16.mxu1 %vm777_vm2, %v776_v38  ;;  %687 = vmatpush3.bf16.msra.mxu1 %v740_v48  ;;  %v741_v49 = vld [vmem:[%s991_s5 + $0x8] sm:$0xff]   ;;  %v582_v52 = vld [vmem:[%s988_s2] ss:$0 sm:$0xff]  ;;  %v742_v0 = vld [vmem:[%s991_s5 + $0x10] sm:$0xff]  }
  0x28   :  { %669 = vmatpush3.bf16.msra.mxu0 %v733_v40  ;;  %688 = vmatprep.subr.bf16.mxu1 %v776_v38  ;;  %v743_v1 = vld [vmem:[%s991_s5 + $0x18] sm:$0xff]   ;;  %v744_v2 = vld [vmem:[%s991_s5 + $0x20] sm:$0xff]   ;;  %v745_v3 = vld [vmem:[%s991_s5 + $0x28] ss:$0 sps:$4 sm:$0x33]   ;;  %s778_s5 = smov [#allocation2]  }
  0x29   :  { %670 = vmatprep.subr.bf16.mxu0 %v776_v38  ;;  %v524_v4 = vsel %vm522_vm4, %v745_v3, 0  ;;  %v610_v5 = vld [vmem:[%s990_s4] ss:$0 sm:$0xff]  ;;  %s574_s12 = sshll.u32 %s778_s5, 4  ;;  %s575_s12 = int_to_ptr.vmem [resolvable:$true] %s574_s12 }
  0x2a   :  { %v620_v13 = vld [vmem:[%s992_s6] ss:$0 sm:$0xff]  ;;  %s750_s4 = scalar_lea.vmem %s575_s12, 32  ;;  %p755_p1 = scmp.lt.s32.totalorder %s575_s12, %s575_s12 }
  0x2b   :  { %689 = vmatpush3.bf16.msra.mxu1 %v741_v49  ;;  %p751_p0 = scmp.ne.s32.totalorder %s575_s12, %s750_s4  ;;  %p756_p2 = scmp.lt.s32.totalorder %s750_s4, %s750_s4 }
  0x2c   :  { %671 = vmatpush3.bf16.msra.mxu0 %v734_v41  ;;  %690 = vmatprep.subr.bf16.mxu1 %v776_v38 }
  0x2d   :  { %672 = vmatprep.subr.bf16.mxu0 %v776_v38  ;;  %p757_p3 = por %p756_p2, %p755_p1 }
  0x2f   :  { %691 = vmatpush3.bf16.msra.mxu1 %v742_v0  ;;  %p758_p4 = pnand %p757_p3, %p751_p0 }
  0x30   :  { %673 = vmatpush3.bf16.msra.mxu0 %v735_v42  ;;  %692 = vmatprep.subr.bf16.mxu1 %v776_v38 }
  0x31   :  { %674 = vmatprep.subr.bf16.mxu0 %v776_v38 }
  0x33   :  { %693 = vmatpush3.bf16.msra.mxu1 %v743_v1 }
  0x34   :  { %675 = vmatpush3.bf16.msra.mxu0 %v736_v43  ;;  %694 = vmatprep.subr.bf16.mxu1 %v776_v38 }
  0x35   :  { %676 = vmatprep.subr.bf16.mxu0 %v776_v38 }
  0x37   :  { %695 = vmatpush3.bf16.msra.mxu1 %v744_v2 }
  0x38   :  { %677 = vmatpush3.bf16.msra.mxu0 %v737_v44  ;;  %696 = vmatprep.subr.bf16.mxu1 %v776_v38 }
  0x39   :  { %678 = vmatprep.subr.bf16.mxu0 %v776_v38 }
  0x3b   :  { %697 = vmatpush3.bf16.msra.mxu1 %v524_v4 }
  0x3c   :  { %679 = vmatpush3.bf16.msra.mxu0 %v738_v45 }
  0x3d   :  { %680 = vmatprep.subr.bf16.mxu0 %v776_v38 }
  0x40   :  { %681 = vmatpush3.bf16.msra.mxu0 %v423_v47 }
  0xf6   :  { %v644_v50 = vpop.f32.mrb[0].mxu0 }
  0xf7   :  { %v645_v51 = vpop.f32.mrb[1].mxu0 }
  0xf8   :  { %v646_v53 = vadd.f32 %v645_v51, %v644_v50  ;;  %v647_v54 = vpop.f32.mrb[2].mxu0 }
  0xf9   :  { %v648_v55 = vpop.f32.mrb[3].mxu0  ;;  %v342_v56 = vpop.f32.mrb[0].mxu1 }
  0xfa   :  { %v303_v57 = vadd.f32 %v646_v53, %v582_v52  ;;  %v344_v58 = vpop.f32.mrb[1].mxu1 }
  0xfb   :  { %v345_v59 = vpop.f32.mrb[2].mxu1 }
  0xfc   :  { %v343_v60 = vadd.f32 %v342_v56, %v303_v57  ;;  %v346_v61 = vpop.f32.mrb[3].mxu1 }
  0xfe   :  { %746 = vtanh.f32 %v343_v60 }
 0x108   :  { %v747_v62 = vpop.eup %746 }
 0x109   :  { %v349_v63 = vpack.c.bf16 %v747_v62, %v747_v62 }
 0x10b   :  { %683 = vmatmul.mubr.msk.bf16.vlgmr.msra.gmra.mrb[4].mxu0 %vm417_vm3, %v349_v63 }
 0x1de   :  { %v459_v6 = vpop.f32.mrb[4].mxu0 }
 0x1df   :  { %v460_v7 = vadd.f32 %v610_v5, %v459_v6  ;;  %v684_v8 = vpop.f32.mrb[5].mxu0 }
 0x1e0   :  { %v462_v9 = vpop.f32.mrb[6].mxu0 }
 0x1e1   :  { %748 = vtanh.f32 %v460_v7  ;;  %v685_v10 = vpop.f32.mrb[7].mxu0 }
 0x1eb   :  { %v749_v11 = vpop.eup %748 }
 0x1ec   :  { %v466_v12 = vpack.c.bf16 %v749_v11, %v749_v11 }
 0x1ee   :  { %699 = vmatmul.mubr.msk.bf16.vlgmr.msra.gmra.mrb[4].mxu1 %vm518_vm5, %v466_v12 }
 0x2c1   :  { %v560_v14 = vpop.f32.mrb[4].mxu1 }
 0x2c2   :  { %v561_v15 = vadd.f32 %v620_v13, %v560_v14  ;;  %v700_v16 = vpop.f32.mrb[5].mxu1 }
 0x2c3   :  { %v563_v17 = vpop.f32.mrb[6].mxu1 }
 0x2c4   :  { %v701_v18 = vpop.f32.mrb[7].mxu1  ;;  %567 = vst.msk [vmem:[#allocation2] sm:$0x3] %vm566_vm6, %v561_v15 }
 0x2c5   :  { %761 = shalt.err (!%p758_p4)
}
 0x2c6   :  { %s762_s6 = scalar_lea.hbm %s993_s7, 32 }
 0x2c7   :  { %p763_p5 = scmp.ne.s32.totalorder %s993_s7, %s762_s6  ;;  %p766_p6 = scmp.lt.u32.totalorder %s762_s6, %s993_s7 }
 0x2c9   :  { %p768_p7 = pnand %p766_p6, %p763_p5 }
 0x2cb   :  { %771 = shalt.err (!%p768_p7)
}
 0x2cc   :  { %577 = dma.vmem_to_hbm [thread:$0]  %s575_s12, 32, %s993_s7, [#allocation3]  }
 0x2cd   :  { %772 = dma.done.wait [#allocation3], 32  }
 0x2ce   :  { %773 = vsyncadd [#allocation3], 4294967264 }
 0x2cf   :  { %581 = vsyncpa [#allocation3], 1 }

</bundles_post_ra>
